<compile_context>
chip_gen: v6e
topology: v6e:2x2x1
jax: 0.10.0
libtpu: 0.0.40
codegen_flags: <defaults>
</compile_context>

<pallas_src>
import jax
import jax.numpy as jnp
from jax import lax
from jax.experimental import pallas as pl
from jax.experimental.pallas import tpu as pltpu

# ----- model hyper-params (small, consistent with the module defaults) -----
B = 2          # batch
N = 8          # sequence length
DIM = 32       # model dim
HEADS = 2
DIM_HEAD = 64
INNER = HEADS * DIM_HEAD          # 128
FF_MULT = 4
HIDDEN = DIM * FF_MULT            # 128
MAX_POS_EMB = 512
SCALE = DIM_HEAD ** -0.5
LN_EPS = 1e-5

PAD = 128                          # lane-dense residual width (DIM=32 zero-padded to 128)

# ----- row offsets inside the single packed (WBIG_ROWS, PAD) parameter slab -----
W1_ROW = 0                         # w1  : rows [0, PAD)            (PAD, HIDDEN), rows [DIM:] zero
WO_ROW = PAD                       # wo  : rows [PAD, PAD+INNER)    (INNER, PAD), cols [DIM:] zero
W2_ROW = PAD + INNER               # w2  : rows [.., ..+HIDDEN)     (HIDDEN, PAD), cols [DIM:] zero
VEC_ROW = PAD + INNER + HIDDEN     # vectors: g1,b1,bo,g2,b2,bb2,g3,b3,bb1 (all lane-padded)
NUM_VEC = 9
WBIG_ROWS = VEC_ROW + NUM_VEC      # 393


def _layernorm_padded(v, g, b):
    """LayerNorm over the first DIM lanes of a zero-padded (rows, PAD) tensor.

    Uses sum/DIM and E[x^2]-mu^2 so the zero padding never pollutes the statistics,
    and zero-padded g/b keep the padded lanes exactly zero on output.
    """
    inv_d = 1.0 / DIM
    mu = jnp.sum(v, axis=-1, keepdims=True) * inv_d
    var = jnp.sum(v * v, axis=-1, keepdims=True) * inv_d - mu * mu
    var = jnp.maximum(var, 0.0)
    return (v - mu) * lax.rsqrt(var + LN_EPS) * g + b


def transformer_block_kernel(x_ref, mask_ref, rel_bd_ref, wqkv_ref, wbig_ref, o_ref):
    bb = x_ref.shape[0]                      # batch elements handled by this grid step
    rows = bb * N

    # ---------------- load & unpack (all lane-dense, no [:, :DIM] slices) ----------------
    x = x_ref[...].reshape(rows, PAD).astype(jnp.float32)             # (rows, PAD)

    w1 = wbig_ref[W1_ROW:W1_ROW + PAD, :]                             # (PAD, HIDDEN)
    wo = wbig_ref[WO_ROW:WO_ROW + INNER, :]                           # (INNER, PAD)
    w2 = wbig_ref[W2_ROW:W2_ROW + HIDDEN, :]                          # (HIDDEN, PAD)
    vecs = wbig_ref[VEC_ROW:VEC_ROW + NUM_VEC, :]                     # (9, PAD)
    g1, b1, bo = vecs[0:1, :], vecs[1:2, :], vecs[2:3, :]
    g2, b2, bb2 = vecs[3:4, :], vecs[4:5, :], vecs[5:6, :]
    g3, b3 = vecs[6:7, :], vecs[7:8, :]
    bb1 = vecs[8:9, :]                                                # (1, HIDDEN)

    # ---------------- attention branch (PreNorm) ----------------
    xn = _layernorm_padded(x, g1, b1)                                 # (rows, PAD)
    # fused QKV: one MXU matmul; 128-lane-aligned splits of the result are free.
    # SCALE is folded into the wq columns at pack time.
    qkv = jnp.dot(xn, wqkv_ref[...], preferred_element_type=jnp.float32)  # (rows, 3*INNER)
    q = qkv[:, 0:INNER]
    k = qkv[:, INNER:2 * INNER]
    v = qkv[:, 2 * INNER:3 * INNER]

    # relative-position scores on the MXU via a block-diagonal matmul; the block-diag
    # structure comes from one VPU multiply with a precomputed {0,1} mask operand:
    #   q_bd[r, i*INNER + c] = q[r, c] * [ (r mod N) == i ]
    #   pos[r, h*N + j]      = sum_d q[r, h*DH + d] * rel[r mod N, j, d]
    q_bd = jnp.tile(q, (1, N)) * mask_ref[...]                        # (rows, N*INNER)
    pos = jnp.dot(q_bd, rel_bd_ref[...],
                  preferred_element_type=jnp.float32)                 # (rows, HEADS*N)

    # batched per-head attention (batch handled by einsum batch dims, not Python concat)
    q3 = q.reshape(bb, N, INNER)
    k3 = k.reshape(bb, N, INNER)
    v3 = v.reshape(bb, N, INNER)
    pos3 = pos.reshape(bb, N, HEADS * N)

    hv_heads = []
    for h in range(HEADS):                                            # static, 2 heads
        cs = slice(h * DIM_HEAD, (h + 1) * DIM_HEAD)
        qh, kh, vh = q3[:, :, cs], k3[:, :, cs], v3[:, :, cs]         # (bb, N, DH)
        dots = jnp.einsum('bid,bjd->bij', qh, kh,
                          preferred_element_type=jnp.float32)         # (bb, N, N)
        dots = dots + pos3[:, :, h * N:(h + 1) * N]
        dots = dots - jnp.max(dots, axis=-1, keepdims=True)
        e = jnp.exp(dots)
        p = e * pl.reciprocal(jnp.sum(e, axis=-1, keepdims=True), approx=True)
        hv_heads.append(jnp.einsum('bij,bjd->bid', p, vh,
                                   preferred_element_type=jnp.float32))   # (bb, N, DH)

    # fuse both heads into ONE output projection (K = INNER reduction on the MXU)
    hv_full = jnp.concatenate(hv_heads, axis=-1).reshape(rows, INNER)     # (rows, INNER)
    attn_out = jnp.dot(hv_full, wo, preferred_element_type=jnp.float32)   # (rows, PAD)
    x = x + attn_out + bo                                             # residual + out-proj bias

    # ---------------- feed-forward branch (PreNorm) ----------------
    xn2 = _layernorm_padded(x, g2, b2)
    h1 = jnp.dot(xn2, w1, preferred_element_type=jnp.float32) + bb1   # (rows, HIDDEN)
    h1 = h1 * jax.nn.sigmoid(h1)                                      # Swish
    ff = jnp.dot(h1, w2, preferred_element_type=jnp.float32) + bb2    # (rows, PAD)
    x = x + ff                                                        # residual

    # ---------------- post layernorm & single lane-dense store ----------------
    x = _layernorm_padded(x, g3, b3)
    o_ref[...] = x.reshape(bb, N, PAD).astype(o_ref.dtype)


# ---------------- wrapper-side packing glue ----------------
def _pad_lanes(a, width=PAD):
    return jnp.pad(a, ((0, 0), (0, width - a.shape[1])))


def _pad_rows(a, rows=PAD):
    return jnp.pad(a, ((0, rows - a.shape[0]), (0, 0)))


def _pack_params(params):
    # fold the attention scale into wq; pad the DIM contraction axis to PAD rows (zeros)
    wq = params["wq"] * SCALE
    w_qkv = _pad_rows(jnp.concatenate([wq, params["wk"], params["wv"]], axis=1))  # (PAD, 3*INNER)

    vec_rows = jnp.concatenate([
        _pad_lanes(params["g1"]), _pad_lanes(params["b1"]), _pad_lanes(params["bo"]),
        _pad_lanes(params["g2"]), _pad_lanes(params["b2"]), _pad_lanes(params["bb2"]),
        _pad_lanes(params["g3"]), _pad_lanes(params["b3"]),
        params["bb1"],
    ], axis=0)                                                                    # (9, PAD)

    w_big = jnp.concatenate([
        _pad_rows(params["w1"]),      # (PAD, HIDDEN), rows [DIM:] zero
        _pad_lanes(params["wo"]),     # (INNER, PAD),  cols [DIM:] zero
        _pad_lanes(params["w2"]),     # (HIDDEN, PAD), cols [DIM:] zero
        vec_rows,                     # (9, PAD)
    ], axis=0)                         # (WBIG_ROWS, PAD)
    return w_qkv, w_big


def _build_rel_blockdiag(emb_table, n):
    """rel_bd[i*INNER + g*DH + d, h*n + j] = rel[i, j, d] * delta(g, h)."""
    seq = jnp.arange(n)
    dist = jnp.clip(seq[:, None] - seq[None, :], -MAX_POS_EMB, MAX_POS_EMB) + MAX_POS_EMB
    rel = emb_table[dist]                                   # (n, n, DH) — nn.Embedding gather
    rel_t = jnp.transpose(rel, (0, 2, 1))                   # (n, DH, n): [i, d, j]
    eye_h = jnp.eye(HEADS, dtype=rel.dtype)
    rel_bd = jnp.einsum('idj,gh->igdhj', rel_t, eye_h)      # (n, H, DH, H, n)
    # TODO(synk): for realistic N, store in bf16 and tile over the key axis instead of
    # keeping the full (N*INNER, HEADS*N) matrix resident (O(N^2) VMEM on v7x's 64 MiB).
    return rel_bd.reshape(n * INNER, HEADS * n)


def _build_blockdiag_mask(rows, n):
    """mask[r, i*INNER + c] = 1.0 iff (r mod n) == i  (precomputed; no in-kernel iota)."""
    r = jnp.arange(rows)[:, None] % n
    blk = (jnp.arange(n * INNER) // INNER)[None, :]
    return (r == blk).astype(jnp.float32)                   # (rows, n*INNER)


def _cost_estimate(batch, mask, rel_bd, w_qkv, w_big):
    m = batch * N
    flops = 2 * m * DIM * (3 * INNER)                       # fused QKV projection
    flops += 2 * m * N * INNER                              # rel-pos block-diag matmul (useful work)
    flops += 2 * batch * HEADS * (N * N * DIM_HEAD) * 2     # q@k^T and attn@v
    flops += 2 * m * INNER * DIM                            # output projection
    flops += 2 * m * DIM * HIDDEN * 2                       # feed-forward
    transc = batch * HEADS * N * N + m * HIDDEN             # exp + sigmoid
    bytes_ = 4 * (2 * m * PAD + int(mask.size) + int(rel_bd.size)
                  + int(w_qkv.size) + int(w_big.size))
    return pl.CostEstimate(flops=int(flops), transcendentals=int(transc),
                           bytes_accessed=int(bytes_))


def transformer_block(x, params, emb_table):
    """x: (B, N, DIM) f32. params: dict of weights. emb_table: (2*MAX_POS_EMB+1, DIM_HEAD)."""
    batch, n, dim = x.shape
    assert (n, dim) == (N, DIM)

    w_qkv, w_big = _pack_params(params)
    rel_bd = _build_rel_blockdiag(emb_table, n)

    # Batch is always folded into one grid step: the whole problem is a few µs of compute,
    # so a megacore (B,) split would only duplicate invariant-operand DMA.
    # TODO(synk): for realistic N, grid over query-row tiles instead (256-512 rows/block).
    bb = batch
    rows = bb * N
    mask = _build_blockdiag_mask(rows, n)                             # (rows, N*INNER)

    x_pad = jnp.pad(x, ((0, 0), (0, 0), (0, PAD - DIM)))              # lane-dense input

    in_specs = [
        pl.BlockSpec((bb, N, PAD), lambda i: (0, 0, 0)),              # x (zero lane-padded)
        pl.BlockSpec((rows, N * INNER), lambda i: (0, 0)),            # block-diag {0,1} mask
        pl.BlockSpec((N * INNER, HEADS * N), lambda i: (0, 0)),       # rel block-diag
        pl.BlockSpec((PAD, 3 * INNER), lambda i: (0, 0)),             # fused QKV weight
        pl.BlockSpec((WBIG_ROWS, PAD), lambda i: (0, 0)),             # packed params
    ]
    out_spec = pl.BlockSpec((bb, N, PAD), lambda i: (0, 0, 0))

    out_pad = pl.pallas_call(
        transformer_block_kernel,
        out_shape=jax.ShapeDtypeStruct((bb, N, PAD), jnp.float32),
        grid_spec=pltpu.PrefetchScalarGridSpec(
            num_scalar_prefetch=0,
            grid=(1,),
            in_specs=in_specs,
            out_specs=out_spec,
        ),
        compiler_params=pltpu.CompilerParams(
            dimension_semantics=("arbitrary",)),
        cost_estimate=_cost_estimate(batch, mask, rel_bd, w_qkv, w_big),
    )(x_pad, mask, rel_bd, w_qkv, w_big)

    return out_pad[..., :DIM]                                         # slice back to DIM lanes


# ---------------- pure-JAX reference (mirrors the PyTorch forward) ----------------
def reference(x, params, emb_table):
    def ln(v, g, b):
        mu = jnp.mean(v, axis=-1, keepdims=True)
        var = jnp.mean((v - mu) ** 2, axis=-1, keepdims=True)
        return (v - mu) * jax.lax.rsqrt(var + LN_EPS) * g[0] + b[0]

    n = x.shape[1]
    # attention (PreNorm)
    xn = ln(x, params["g1"], params["b1"])
    q = xn @ params["wq"]
    k = xn @ params["wk"]
    v = xn @ params["wv"]
    reshape_h = lambda t: t.reshape(B, n, HEADS, DIM_HEAD).transpose(0, 2, 1, 3)
    q, k, v = map(reshape_h, (q, k, v))                       # (B, H, N, DH)
    dots = jnp.einsum("bhid,bhjd->bhij", q, k) * SCALE
    seq = jnp.arange(n)
    dist = jnp.clip(seq[:, None] - seq[None, :], -MAX_POS_EMB, MAX_POS_EMB) + MAX_POS_EMB
    rel = emb_table[dist]                                     # (N, N, DH)
    pos = jnp.einsum("bhnd,nrd->bhnr", q, rel) * SCALE
    dots = dots + pos
    attn = jax.nn.softmax(dots, axis=-1)
    out = jnp.einsum("bhij,bhjd->bhid", attn, v)
    out = out.transpose(0, 2, 1, 3).reshape(B, n, INNER)
    attn_out = out @ params["wo"] + params["bo"][0]
    x = x + attn_out
    # feed-forward (PreNorm)
    xn2 = ln(x, params["g2"], params["b2"])
    h1 = xn2 @ params["w1"] + params["bb1"][0]
    h1 = h1 * jax.nn.sigmoid(h1)
    ff = h1 @ params["w2"] + params["bb2"][0]
    x = x + ff
    # post norm
    return ln(x, params["g3"], params["b3"])


if __name__ == "__main__":
    key = jax.random.PRNGKey(0)
    keys = jax.random.split(key, 12)

    def rnd(k, shape, scale=0.1):
        return jax.random.normal(k, shape, dtype=jnp.float32) * scale

    params = {
        "g1": jnp.ones((1, DIM), jnp.float32),
        "b1": jnp.zeros((1, DIM), jnp.float32),
        "wq": rnd(keys[0], (DIM, INNER)),
        "wk": rnd(keys[1], (DIM, INNER)),
        "wv": rnd(keys[2], (DIM, INNER)),
        "wo": rnd(keys[3], (INNER, DIM)),
        "bo": rnd(keys[4], (1, DIM)),
        "g2": jnp.ones((1, DIM), jnp.float32),
        "b2": jnp.zeros((1, DIM), jnp.float32),
        "w1": rnd(keys[5], (DIM, HIDDEN)),
        "bb1": rnd(keys[6], (1, HIDDEN)),
        "w2": rnd(keys[7], (HIDDEN, DIM)),
        "bb2": rnd(keys[8], (1, DIM)),
        "g3": jnp.ones((1, DIM), jnp.float32),
        "b3": jnp.zeros((1, DIM), jnp.float32),
    }
    emb_table = rnd(keys[9], (2 * MAX_POS_EMB + 1, DIM_HEAD))
    x = jax.random.normal(keys[10], (B, N, DIM), dtype=jnp.float32)

    out = transformer_block(x, params, emb_table)
    out = jax.block_until_ready(out)

    ref = reference(x, params, emb_table)
    assert out.shape == (B, N, DIM)
    # tolerance is slightly looser than exact f32 because the softmax denominator uses the
    # EUP approximate reciprocal (pl.reciprocal(approx=True)).
    assert jnp.allclose(out, ref, atol=5e-3, rtol=5e-3), "mismatch vs pure-JAX reference"

    print("KERNEL_OK")
</pallas_src>

<mosaic_0001>
module attributes {stable_mosaic.version = 11 : i64} {
  func.func @transformer_block_kernel(%arg0: i32, %arg1: memref<2x8x128xf32, #tpu.memory_space<vmem>>, %arg2: memref<16x1024xf32, #tpu.memory_space<vmem>>, %arg3: memref<1024x16xf32, #tpu.memory_space<vmem>>, %arg4: memref<128x384xf32, #tpu.memory_space<vmem>>, %arg5: memref<393x128xf32, #tpu.memory_space<vmem>>, %arg6: memref<2x8x128xf32, #tpu.memory_space<vmem>>) attributes {dimension_semantics = [#tpu.dimension_semantics<arbitrary>], iteration_bounds = array<i64: 1>, scalar_prefetch = 0 : i64, scratch_operands = 0 : i64, tpu.core_type = #tpu.core_type<tc>, window_params = [{pipeline_mode = #tpu.pipeline_mode<synchronous>, transform_indices = @transform_0, window_bounds = array<i64: 2, 8, 128>}, {pipeline_mode = #tpu.pipeline_mode<synchronous>, transform_indices = @transform_1, window_bounds = array<i64: 16, 1024>}, {pipeline_mode = #tpu.pipeline_mode<synchronous>, transform_indices = @transform_2, window_bounds = array<i64: 1024, 16>}, {pipeline_mode = #tpu.pipeline_mode<synchronous>, transform_indices = @transform_3, window_bounds = array<i64: 128, 384>}, {pipeline_mode = #tpu.pipeline_mode<synchronous>, transform_indices = @transform_4, window_bounds = array<i64: 393, 128>}, {pipeline_mode = #tpu.pipeline_mode<synchronous>, transform_indices = @transform_5, window_bounds = array<i64: 2, 8, 128>}]} {
    %c0 = arith.constant 0 : index
    %c0_0 = arith.constant 0 : index
    %c0_1 = arith.constant 0 : index
    %0 = vector.load %arg1[%c0, %c0_0, %c0_1] : memref<2x8x128xf32, #tpu.memory_space<vmem>>, vector<2x8x128xf32>
    %1 = vector.shape_cast %0 : vector<2x8x128xf32> to vector<16x128xf32>
    %c0_2 = arith.constant 0 : index
    %c0_3 = arith.constant 0 : index
    %2 = vector.load %arg5[%c0_2, %c0_3] : memref<393x128xf32, #tpu.memory_space<vmem>>, vector<128x128xf32>
    %c128 = arith.constant 128 : index
    %c0_4 = arith.constant 0 : index
    %3 = vector.load %arg5[%c128, %c0_4] : memref<393x128xf32, #tpu.memory_space<vmem>>, vector<128x128xf32>
    %c256 = arith.constant 256 : index
    %c0_5 = arith.constant 0 : index
    %4 = vector.load %arg5[%c256, %c0_5] : memref<393x128xf32, #tpu.memory_space<vmem>>, vector<128x128xf32>
    %c384 = arith.constant 384 : index
    %c0_6 = arith.constant 0 : index
    %5 = vector.load %arg5[%c384, %c0_6] : memref<393x128xf32, #tpu.memory_space<vmem>>, vector<9x128xf32>
    %6 = vector.extract_strided_slice %5 {offsets = [0, 0], sizes = [1, 128], strides = [1, 1]} : vector<9x128xf32> to vector<1x128xf32>
    %7 = vector.extract_strided_slice %5 {offsets = [1, 0], sizes = [1, 128], strides = [1, 1]} : vector<9x128xf32> to vector<1x128xf32>
    %8 = vector.extract_strided_slice %5 {offsets = [2, 0], sizes = [1, 128], strides = [1, 1]} : vector<9x128xf32> to vector<1x128xf32>
    %9 = vector.extract_strided_slice %5 {offsets = [3, 0], sizes = [1, 128], strides = [1, 1]} : vector<9x128xf32> to vector<1x128xf32>
    %10 = vector.extract_strided_slice %5 {offsets = [4, 0], sizes = [1, 128], strides = [1, 1]} : vector<9x128xf32> to vector<1x128xf32>
    %11 = vector.extract_strided_slice %5 {offsets = [5, 0], sizes = [1, 128], strides = [1, 1]} : vector<9x128xf32> to vector<1x128xf32>
    %12 = vector.extract_strided_slice %5 {offsets = [6, 0], sizes = [1, 128], strides = [1, 1]} : vector<9x128xf32> to vector<1x128xf32>
    %13 = vector.extract_strided_slice %5 {offsets = [7, 0], sizes = [1, 128], strides = [1, 1]} : vector<9x128xf32> to vector<1x128xf32>
    %14 = vector.extract_strided_slice %5 {offsets = [8, 0], sizes = [1, 128], strides = [1, 1]} : vector<9x128xf32> to vector<1x128xf32>
    %cst = arith.constant dense<0.000000e+00> : vector<16xf32>
    %15 = vector.multi_reduction <add>, %1, %cst [1] : vector<16x128xf32> to vector<16xf32>
    %16 = vector.shape_cast %15 : vector<16xf32> to vector<16x1xf32>
    %cst_7 = arith.constant 3.125000e-02 : f32
    %17 = vector.broadcast %cst_7 : f32 to vector<16x1xf32>
    %18 = arith.mulf %16, %17 : vector<16x1xf32>
    %19 = arith.mulf %1, %1 : vector<16x128xf32>
    %cst_8 = arith.constant dense<0.000000e+00> : vector<16xf32>
    %20 = vector.multi_reduction <add>, %19, %cst_8 [1] : vector<16x128xf32> to vector<16xf32>
    %21 = vector.shape_cast %20 : vector<16xf32> to vector<16x1xf32>
    %cst_9 = arith.constant 3.125000e-02 : f32
    %22 = vector.broadcast %cst_9 : f32 to vector<16x1xf32>
    %23 = arith.mulf %21, %22 : vector<16x1xf32>
    %24 = arith.mulf %18, %18 : vector<16x1xf32>
    %25 = arith.subf %23, %24 : vector<16x1xf32>
    %cst_10 = arith.constant 0.000000e+00 : f32
    %26 = vector.broadcast %cst_10 : f32 to vector<16x1xf32>
    %27 = arith.maximumf %25, %26 : vector<16x1xf32>
    %28 = vector.broadcast %18 : vector<16x1xf32> to vector<16x128xf32>
    %29 = arith.subf %1, %28 : vector<16x128xf32>
    %cst_11 = arith.constant 9.99999974E-6 : f32
    %30 = vector.broadcast %cst_11 : f32 to vector<16x1xf32>
    %31 = arith.addf %27, %30 : vector<16x1xf32>
    %32 = math.rsqrt %31 : vector<16x1xf32>
    %33 = vector.broadcast %32 : vector<16x1xf32> to vector<16x128xf32>
    %34 = arith.mulf %29, %33 : vector<16x128xf32>
    %35 = vector.broadcast %6 : vector<1x128xf32> to vector<16x128xf32>
    %36 = arith.mulf %34, %35 : vector<16x128xf32>
    %37 = vector.broadcast %7 : vector<1x128xf32> to vector<16x128xf32>
    %38 = arith.addf %36, %37 : vector<16x128xf32>
    %c0_12 = arith.constant 0 : index
    %c0_13 = arith.constant 0 : index
    %39 = vector.load %arg4[%c0_12, %c0_13] : memref<128x384xf32, #tpu.memory_space<vmem>>, vector<128x384xf32>
    %cst_14 = arith.constant dense<0.000000e+00> : vector<16x384xf32>
    %40 = tpu.matmul %38, %39, %cst_14 {dimension_numbers = #tpu.dot_dimension_numbers<[1], [0], [0], [1], [0, 0, 1, 1], [], []>} : vector<16x128xf32>, vector<128x384xf32>, vector<16x384xf32> -> vector<16x384xf32>
    %41 = vector.extract_strided_slice %40 {offsets = [0, 0], sizes = [16, 128], strides = [1, 1]} : vector<16x384xf32> to vector<16x128xf32>
    %42 = vector.extract_strided_slice %40 {offsets = [0, 128], sizes = [16, 128], strides = [1, 1]} : vector<16x384xf32> to vector<16x128xf32>
    %43 = vector.extract_strided_slice %40 {offsets = [0, 256], sizes = [16, 128], strides = [1, 1]} : vector<16x384xf32> to vector<16x128xf32>
    %44 = tpu.concatenate %41, %41, %41, %41, %41, %41, %41, %41 in 1 : vector<16x128xf32>, vector<16x128xf32>, vector<16x128xf32>, vector<16x128xf32>, vector<16x128xf32>, vector<16x128xf32>, vector<16x128xf32>, vector<16x128xf32> -> vector<16x1024xf32>
    %c0_15 = arith.constant 0 : index
    %c0_16 = arith.constant 0 : index
    %45 = vector.load %arg2[%c0_15, %c0_16] : memref<16x1024xf32, #tpu.memory_space<vmem>>, vector<16x1024xf32>
    %46 = arith.mulf %44, %45 : vector<16x1024xf32>
    %c0_17 = arith.constant 0 : index
    %c0_18 = arith.constant 0 : index
    %47 = vector.load %arg3[%c0_17, %c0_18] : memref<1024x16xf32, #tpu.memory_space<vmem>>, vector<1024x16xf32>
    %cst_19 = arith.constant dense<0.000000e+00> : vector<16x16xf32>
    %48 = tpu.matmul %46, %47, %cst_19 {dimension_numbers = #tpu.dot_dimension_numbers<[1], [0], [0], [1], [0, 0, 1, 1], [], []>} : vector<16x1024xf32>, vector<1024x16xf32>, vector<16x16xf32> -> vector<16x16xf32>
    %49 = vector.shape_cast %41 : vector<16x128xf32> to vector<2x8x128xf32>
    %50 = vector.shape_cast %42 : vector<16x128xf32> to vector<2x8x128xf32>
    %51 = vector.shape_cast %43 : vector<16x128xf32> to vector<2x8x128xf32>
    %52 = vector.shape_cast %48 : vector<16x16xf32> to vector<2x8x16xf32>
    %53 = vector.extract_strided_slice %49 {offsets = [0, 0, 0], sizes = [2, 8, 64], strides = [1, 1, 1]} : vector<2x8x128xf32> to vector<2x8x64xf32>
    %54 = vector.extract_strided_slice %50 {offsets = [0, 0, 0], sizes = [2, 8, 64], strides = [1, 1, 1]} : vector<2x8x128xf32> to vector<2x8x64xf32>
    %55 = vector.extract_strided_slice %51 {offsets = [0, 0, 0], sizes = [2, 8, 64], strides = [1, 1, 1]} : vector<2x8x128xf32> to vector<2x8x64xf32>
    "tpu.trace_start"() <{level = 10 : i32, message = "bid,bjd->bij"}> : () -> ()
    %cst_20 = arith.constant dense<0.000000e+00> : vector<2x8x8xf32>
    %56 = tpu.matmul %53, %54, %cst_20 {dimension_numbers = #tpu.dot_dimension_numbers<[2], [2], [1], [1], [0, 0, 0, 1, 1, 1], [0], [0]>} : vector<2x8x64xf32>, vector<2x8x64xf32>, vector<2x8x8xf32> -> vector<2x8x8xf32>
    "tpu.trace_stop"() : () -> ()
    %57 = vector.extract_strided_slice %52 {offsets = [0, 0, 0], sizes = [2, 8, 8], strides = [1, 1, 1]} : vector<2x8x16xf32> to vector<2x8x8xf32>
    %58 = arith.addf %56, %57 : vector<2x8x8xf32>
    %cst_21 = arith.constant dense<0xFF800000> : vector<2x8xf32>
    %59 = vector.multi_reduction <maximumf>, %58, %cst_21 [2] : vector<2x8x8xf32> to vector<2x8xf32>
    %60 = vector.shape_cast %59 : vector<2x8xf32> to vector<2x8x1xf32>
    %61 = vector.broadcast %60 : vector<2x8x1xf32> to vector<2x8x8xf32>
    %62 = arith.subf %58, %61 : vector<2x8x8xf32>
    %63 = math.exp %62 : vector<2x8x8xf32>
    %cst_22 = arith.constant dense<0.000000e+00> : vector<2x8xf32>
    %64 = vector.multi_reduction <add>, %63, %cst_22 [2] : vector<2x8x8xf32> to vector<2x8xf32>
    %65 = vector.shape_cast %64 : vector<2x8xf32> to vector<2x8x1xf32>
    %66 = tpu.reciprocal %65 {approx = true} : vector<2x8x1xf32> -> vector<2x8x1xf32>
    %67 = vector.broadcast %66 : vector<2x8x1xf32> to vector<2x8x8xf32>
    %68 = arith.mulf %63, %67 : vector<2x8x8xf32>
    "tpu.trace_start"() <{level = 10 : i32, message = "bij,bjd->bid"}> : () -> ()
    %cst_23 = arith.constant dense<0.000000e+00> : vector<2x8x64xf32>
    %69 = tpu.matmul %68, %55, %cst_23 {dimension_numbers = #tpu.dot_dimension_numbers<[2], [1], [1], [2], [0, 0, 0, 1, 1, 2], [0], [0]>} : vector<2x8x8xf32>, vector<2x8x64xf32>, vector<2x8x64xf32> -> vector<2x8x64xf32>
    "tpu.trace_stop"() : () -> ()
    %70 = vector.extract_strided_slice %49 {offsets = [0, 0, 64], sizes = [2, 8, 64], strides = [1, 1, 1]} : vector<2x8x128xf32> to vector<2x8x64xf32>
    %71 = vector.extract_strided_slice %50 {offsets = [0, 0, 64], sizes = [2, 8, 64], strides = [1, 1, 1]} : vector<2x8x128xf32> to vector<2x8x64xf32>
    %72 = vector.extract_strided_slice %51 {offsets = [0, 0, 64], sizes = [2, 8, 64], strides = [1, 1, 1]} : vector<2x8x128xf32> to vector<2x8x64xf32>
    "tpu.trace_start"() <{level = 10 : i32, message = "bid,bjd->bij"}> : () -> ()
    %cst_24 = arith.constant dense<0.000000e+00> : vector<2x8x8xf32>
    %73 = tpu.matmul %70, %71, %cst_24 {dimension_numbers = #tpu.dot_dimension_numbers<[2], [2], [1], [1], [0, 0, 0, 1, 1, 1], [0], [0]>} : vector<2x8x64xf32>, vector<2x8x64xf32>, vector<2x8x8xf32> -> vector<2x8x8xf32>
    "tpu.trace_stop"() : () -> ()
    %74 = vector.extract_strided_slice %52 {offsets = [0, 0, 8], sizes = [2, 8, 8], strides = [1, 1, 1]} : vector<2x8x16xf32> to vector<2x8x8xf32>
    %75 = arith.addf %73, %74 : vector<2x8x8xf32>
    %cst_25 = arith.constant dense<0xFF800000> : vector<2x8xf32>
    %76 = vector.multi_reduction <maximumf>, %75, %cst_25 [2] : vector<2x8x8xf32> to vector<2x8xf32>
    %77 = vector.shape_cast %76 : vector<2x8xf32> to vector<2x8x1xf32>
    %78 = vector.broadcast %77 : vector<2x8x1xf32> to vector<2x8x8xf32>
    %79 = arith.subf %75, %78 : vector<2x8x8xf32>
    %80 = math.exp %79 : vector<2x8x8xf32>
    %cst_26 = arith.constant dense<0.000000e+00> : vector<2x8xf32>
    %81 = vector.multi_reduction <add>, %80, %cst_26 [2] : vector<2x8x8xf32> to vector<2x8xf32>
    %82 = vector.shape_cast %81 : vector<2x8xf32> to vector<2x8x1xf32>
    %83 = tpu.reciprocal %82 {approx = true} : vector<2x8x1xf32> -> vector<2x8x1xf32>
    %84 = vector.broadcast %83 : vector<2x8x1xf32> to vector<2x8x8xf32>
    %85 = arith.mulf %80, %84 : vector<2x8x8xf32>
    "tpu.trace_start"() <{level = 10 : i32, message = "bij,bjd->bid"}> : () -> ()
    %cst_27 = arith.constant dense<0.000000e+00> : vector<2x8x64xf32>
    %86 = tpu.matmul %85, %72, %cst_27 {dimension_numbers = #tpu.dot_dimension_numbers<[2], [1], [1], [2], [0, 0, 0, 1, 1, 2], [0], [0]>} : vector<2x8x8xf32>, vector<2x8x64xf32>, vector<2x8x64xf32> -> vector<2x8x64xf32>
    "tpu.trace_stop"() : () -> ()
    %87 = tpu.concatenate %69, %86 in 2 : vector<2x8x64xf32>, vector<2x8x64xf32> -> vector<2x8x128xf32>
    %88 = vector.shape_cast %87 : vector<2x8x128xf32> to vector<16x128xf32>
    %cst_28 = arith.constant dense<0.000000e+00> : vector<16x128xf32>
    %89 = tpu.matmul %88, %3, %cst_28 {dimension_numbers = #tpu.dot_dimension_numbers<[1], [0], [0], [1], [0, 0, 1, 1], [], []>} : vector<16x128xf32>, vector<128x128xf32>, vector<16x128xf32> -> vector<16x128xf32>
    %90 = arith.addf %1, %89 : vector<16x128xf32>
    %91 = vector.broadcast %8 : vector<1x128xf32> to vector<16x128xf32>
    %92 = arith.addf %90, %91 : vector<16x128xf32>
    %cst_29 = arith.constant dense<0.000000e+00> : vector<16xf32>
    %93 = vector.multi_reduction <add>, %92, %cst_29 [1] : vector<16x128xf32> to vector<16xf32>
    %94 = vector.shape_cast %93 : vector<16xf32> to vector<16x1xf32>
    %cst_30 = arith.constant 3.125000e-02 : f32
    %95 = vector.broadcast %cst_30 : f32 to vector<16x1xf32>
    %96 = arith.mulf %94, %95 : vector<16x1xf32>
    %97 = arith.mulf %92, %92 : vector<16x128xf32>
    %cst_31 = arith.constant dense<0.000000e+00> : vector<16xf32>
    %98 = vector.multi_reduction <add>, %97, %cst_31 [1] : vector<16x128xf32> to vector<16xf32>
    %99 = vector.shape_cast %98 : vector<16xf32> to vector<16x1xf32>
    %cst_32 = arith.constant 3.125000e-02 : f32
    %100 = vector.broadcast %cst_32 : f32 to vector<16x1xf32>
    %101 = arith.mulf %99, %100 : vector<16x1xf32>
    %102 = arith.mulf %96, %96 : vector<16x1xf32>
    %103 = arith.subf %101, %102 : vector<16x1xf32>
    %cst_33 = arith.constant 0.000000e+00 : f32
    %104 = vector.broadcast %cst_33 : f32 to vector<16x1xf32>
    %105 = arith.maximumf %103, %104 : vector<16x1xf32>
    %106 = vector.broadcast %96 : vector<16x1xf32> to vector<16x128xf32>
    %107 = arith.subf %92, %106 : vector<16x128xf32>
    %cst_34 = arith.constant 9.99999974E-6 : f32
    %108 = vector.broadcast %cst_34 : f32 to vector<16x1xf32>
    %109 = arith.addf %105, %108 : vector<16x1xf32>
    %110 = math.rsqrt %109 : vector<16x1xf32>
    %111 = vector.broadcast %110 : vector<16x1xf32> to vector<16x128xf32>
    %112 = arith.mulf %107, %111 : vector<16x128xf32>
    %113 = vector.broadcast %9 : vector<1x128xf32> to vector<16x128xf32>
    %114 = arith.mulf %112, %113 : vector<16x128xf32>
    %115 = vector.broadcast %10 : vector<1x128xf32> to vector<16x128xf32>
    %116 = arith.addf %114, %115 : vector<16x128xf32>
    %cst_35 = arith.constant dense<0.000000e+00> : vector<16x128xf32>
    %117 = tpu.matmul %116, %2, %cst_35 {dimension_numbers = #tpu.dot_dimension_numbers<[1], [0], [0], [1], [0, 0, 1, 1], [], []>} : vector<16x128xf32>, vector<128x128xf32>, vector<16x128xf32> -> vector<16x128xf32>
    %118 = vector.broadcast %14 : vector<1x128xf32> to vector<16x128xf32>
    %119 = arith.addf %117, %118 : vector<16x128xf32>
    %120 = arith.negf %119 : vector<16x128xf32>
    %121 = math.exp %120 : vector<16x128xf32>
    %cst_36 = arith.constant 1.000000e+00 : f32
    %122 = vector.broadcast %cst_36 : f32 to vector<16x128xf32>
    %123 = arith.addf %122, %121 : vector<16x128xf32>
    %124 = arith.divf %122, %123 : vector<16x128xf32>
    %125 = arith.mulf %119, %124 : vector<16x128xf32>
    %cst_37 = arith.constant dense<0.000000e+00> : vector<16x128xf32>
    %126 = tpu.matmul %125, %4, %cst_37 {dimension_numbers = #tpu.dot_dimension_numbers<[1], [0], [0], [1], [0, 0, 1, 1], [], []>} : vector<16x128xf32>, vector<128x128xf32>, vector<16x128xf32> -> vector<16x128xf32>
    %127 = vector.broadcast %11 : vector<1x128xf32> to vector<16x128xf32>
    %128 = arith.addf %126, %127 : vector<16x128xf32>
    %129 = arith.addf %92, %128 : vector<16x128xf32>
    %cst_38 = arith.constant dense<0.000000e+00> : vector<16xf32>
    %130 = vector.multi_reduction <add>, %129, %cst_38 [1] : vector<16x128xf32> to vector<16xf32>
    %131 = vector.shape_cast %130 : vector<16xf32> to vector<16x1xf32>
    %cst_39 = arith.constant 3.125000e-02 : f32
    %132 = vector.broadcast %cst_39 : f32 to vector<16x1xf32>
    %133 = arith.mulf %131, %132 : vector<16x1xf32>
    %134 = arith.mulf %129, %129 : vector<16x128xf32>
    %cst_40 = arith.constant dense<0.000000e+00> : vector<16xf32>
    %135 = vector.multi_reduction <add>, %134, %cst_40 [1] : vector<16x128xf32> to vector<16xf32>
    %136 = vector.shape_cast %135 : vector<16xf32> to vector<16x1xf32>
    %cst_41 = arith.constant 3.125000e-02 : f32
    %137 = vector.broadcast %cst_41 : f32 to vector<16x1xf32>
    %138 = arith.mulf %136, %137 : vector<16x1xf32>
    %139 = arith.mulf %133, %133 : vector<16x1xf32>
    %140 = arith.subf %138, %139 : vector<16x1xf32>
    %cst_42 = arith.constant 0.000000e+00 : f32
    %141 = vector.broadcast %cst_42 : f32 to vector<16x1xf32>
    %142 = arith.maximumf %140, %141 : vector<16x1xf32>
    %143 = vector.broadcast %133 : vector<16x1xf32> to vector<16x128xf32>
    %144 = arith.subf %129, %143 : vector<16x128xf32>
    %cst_43 = arith.constant 9.99999974E-6 : f32
    %145 = vector.broadcast %cst_43 : f32 to vector<16x1xf32>
    %146 = arith.addf %142, %145 : vector<16x1xf32>
    %147 = math.rsqrt %146 : vector<16x1xf32>
    %148 = vector.broadcast %147 : vector<16x1xf32> to vector<16x128xf32>
    %149 = arith.mulf %144, %148 : vector<16x128xf32>
    %150 = vector.broadcast %12 : vector<1x128xf32> to vector<16x128xf32>
    %151 = arith.mulf %149, %150 : vector<16x128xf32>
    %152 = vector.broadcast %13 : vector<1x128xf32> to vector<16x128xf32>
    %153 = arith.addf %151, %152 : vector<16x128xf32>
    %154 = vector.shape_cast %153 : vector<16x128xf32> to vector<2x8x128xf32>
    %c0_44 = arith.constant 0 : index
    %c0_45 = arith.constant 0 : index
    %c0_46 = arith.constant 0 : index
    %155 = vector.load %arg6[%c0_44, %c0_45, %c0_46] : memref<2x8x128xf32, #tpu.memory_space<vmem>>, vector<2x8x128xf32>
    tpu.vector_store %arg6[%c0_44, %c0_45, %c0_46], %154 {strides = array<i32>} : memref<2x8x128xf32, #tpu.memory_space<vmem>>, vector<2x8x128xf32>,
    return
  }
  func.func @transform_0(%arg0: i32) -> (i32, i32, i32) {
    %c0_i32 = arith.constant 0 : i32
    %c0_i32_0 = arith.constant 0 : i32
    %c0_i32_1 = arith.constant 0 : i32
    %c0_i32_2 = arith.constant 0 : i32
    return %c0_i32, %c0_i32_0, %c0_i32_1 : i32, i32, i32
  }
  func.func @transform_1(%arg0: i32) -> (i32, i32) {
    %c0_i32 = arith.constant 0 : i32
    %c0_i32_0 = arith.constant 0 : i32
    %c0_i32_1 = arith.constant 0 : i32
    return %c0_i32, %c0_i32_0 : i32, i32
  }
  func.func @transform_2(%arg0: i32) -> (i32, i32) {
    %c0_i32 = arith.constant 0 : i32
    %c0_i32_0 = arith.constant 0 : i32
    %c0_i32_1 = arith.constant 0 : i32
    return %c0_i32, %c0_i32_0 : i32, i32
  }
  func.func @transform_3(%arg0: i32) -> (i32, i32) {
    %c0_i32 = arith.constant 0 : i32
    %c0_i32_0 = arith.constant 0 : i32
    %c0_i32_1 = arith.constant 0 : i32
    return %c0_i32, %c0_i32_0 : i32, i32
  }
  func.func @transform_4(%arg0: i32) -> (i32, i32) {
    %c0_i32 = arith.constant 0 : i32
    %c0_i32_0 = arith.constant 0 : i32
    %c0_i32_1 = arith.constant 0 : i32
    return %c0_i32, %c0_i32_0 : i32, i32
  }
  func.func @transform_5(%arg0: i32) -> (i32, i32, i32) {
    %c0_i32 = arith.constant 0 : i32
    %c0_i32_0 = arith.constant 0 : i32
    %c0_i32_1 = arith.constant 0 : i32
    %c0_i32_2 = arith.constant 0 : i32
    return %c0_i32, %c0_i32_0, %c0_i32_1 : i32, i32, i32
  }
}

</mosaic_0001>

<bundles_post_ra>
// kernel: tpu_custom_call.1
= control target key start
LH: loop header
LB: loop body
LE: loop exit
PB: predicated region body
PF: predicated region fallthrough
CT: control target
= control target key end

     0   :  { %s3230_s0 = inlined_call_operand.vmem [shape: f32[2,8,128], index: 0, kind: input, shape index: {}]   ;;  %s3231_s1 = inlined_call_operand.vmem [shape: f32[16,1024], index: 1, kind: input, shape index: {}]   ;;  %s3232_s2 = inlined_call_operand.vmem [shape: f32[1024,16], index: 2, kind: input, shape index: {}]   ;;  %s3233_s3 = inlined_call_operand.vmem [shape: f32[128,384], index: 3, kind: input, shape index: {}]   ;;  %s3234_s4 = inlined_call_operand.vmem [shape: f32[393,128], index: 4, kind: input, shape index: {}]   ;;  %s3235_s5 = inlined_call_operand.hbm [shape: f32[2,8,128], index: 5, kind: output, shape index: {}]  }
   0x1   :  { %v2348_v0 = vld [vmem:[%s3230_s0] sm:$0xff]  ;;  %v2353_v1 = vld [vmem:[%s3230_s0 + $0x8] sm:$0xff] }
   0x2   :  { %10 = vsyncpa [#allocation3], 0  ;;  %73 = vadd.xlane.f32.xlu0 %v2348_v0  ;;  %75 = vadd.xlane.f32.xlu1 %v2353_v1  ;;  %v79_v2 = vmul.f32 %v2348_v0, %v2348_v0  ;;  %v80_v3 = vmul.f32 %v2353_v1, %v2353_v1  ;;  %v159_v4 = vld [vmem:[%s3233_s3 + $0x170] sm:$0xff]  ;;  %v158_v5 = vld [vmem:[%s3233_s3 + $0x168] sm:$0xff]  ;;  %v2308_v50 = vmov 0.0   ;;  %vm773_vm0 = vcmask 523264  }
   0x3   :  { %161 = vmatprep.subr.mxu0 %v159_v4  ;;  %v156_v6 = vld [vmem:[%s3233_s3 + $0x158] sm:$0xff]  ;;  %v155_v7 = vld [vmem:[%s3233_s3 + $0x150] sm:$0xff]  ;;  %v153_v9 = vld [vmem:[%s3233_s3 + $0x140] sm:$0xff]  ;;  %225 = vmatprep.mubr.f32.mxu0 %v2308_v50  ;;  %vm2309_vm1 = vmmov 0   ;;  %vm926_vm2 = vcmask 64512   ;;  %s2311_s21 = smov 120  }
   0x4   :  { %162 = vmatpush1.msra.mxu0 %v158_v5  ;;  %v160_v8 = vld [vmem:[%s3233_s3 + $0x178] sm:$0xff]  ;;  %v157_v11 = vld [vmem:[%s3233_s3 + $0x160] sm:$0xff]  ;;  %v150_v12 = vld [vmem:[%s3233_s3 + $0x128] sm:$0xff] }
   0x5   :  { %163 = vmatprep.subr.mxu0 %v156_v6  ;;  %2055 = vmatprep.subr.mxu1 %v160_v8  ;;  %v152_v10 = vld [vmem:[%s3233_s3 + $0x138] sm:$0xff]  ;;  %v149_v13 = vld [vmem:[%s3233_s3 + $0x120] sm:$0xff]  ;;  %v154_v14 = vld [vmem:[%s3233_s3 + $0x148] sm:$0xff] }
   0x6   :  { %81 = vadd.xlane.f32.xlu0 %v79_v2  ;;  %83 = vadd.xlane.f32.xlu1 %v80_v3  ;;  %v147_v15 = vld [vmem:[%s3233_s3 + $0x110] sm:$0xff]  ;;  %v146_v16 = vld [vmem:[%s3233_s3 + $0x108] sm:$0xff]  ;;  %v144_v18 = vld [vmem:[%s3233_s3 + $0xf8] sm:$0xff] }
   0x7   :  { %164 = vmatpush1.msra.mxu0 %v155_v7  ;;  %2056 = vmatpush3.msra.mxu1 %v160_v8  ;;  %v151_v17 = vld [vmem:[%s3233_s3 + $0x130] sm:$0xff]  ;;  %v148_v20 = vld [vmem:[%s3233_s3 + $0x118] sm:$0xff]  ;;  %v141_v21 = vld [vmem:[%s3233_s3 + $0xe0] sm:$0xff] }
   0x8   :  { %165 = vmatprep.subr.mxu0 %v153_v9  ;;  %2057 = vmatprep.subr.mxu1 %v157_v11  ;;  %v143_v19 = vld [vmem:[%s3233_s3 + $0xf0] sm:$0xff]  ;;  %v140_v22 = vld [vmem:[%s3233_s3 + $0xd8] sm:$0xff]  ;;  %v145_v23 = vld [vmem:[%s3233_s3 + $0x100] sm:$0xff]  ;;  %v101_v9 = vlaneseq }
   0x9   :  { %166 = vmatpush1.msra.mxu0 %v152_v10  ;;  %2058 = vmatpush3.msra.mxu1 %v157_v11  ;;  %v138_v24 = vld [vmem:[%s3233_s3 + $0xc8] sm:$0xff]  ;;  %v137_v25 = vld [vmem:[%s3233_s3 + $0xc0] sm:$0xff]  ;;  %v135_v26 = vld [vmem:[%s3233_s3 + $0xb0] sm:$0xff] }
   0xa   :  { %167 = vmatprep.subr.mxu0 %v150_v12  ;;  %2059 = vmatprep.subr.mxu1 %v154_v14  ;;  %v142_v27 = vld [vmem:[%s3233_s3 + $0xe8] sm:$0xff]  ;;  %v132_v29 = vld [vmem:[%s3233_s3 + $0x98] sm:$0xff]  ;;  %v139_v30 = vld [vmem:[%s3233_s3 + $0xd0] sm:$0xff]  ;;  %v2512_v10 = vshrl.u32 %v101_v9, 7 }
   0xb   :  { %168 = vmatpush1.msra.mxu0 %v149_v13  ;;  %2060 = vmatpush3.msra.mxu1 %v154_v14  ;;  %v134_v28 = vld [vmem:[%s3233_s3 + $0xa8] sm:$0xff]  ;;  %v131_v31 = vld [vmem:[%s3233_s3 + $0x90] sm:$0xff]  ;;  %v136_v32 = vld [vmem:[%s3233_s3 + $0xb8] sm:$0xff] }
   0xc   :  { %169 = vmatprep.subr.mxu0 %v147_v15  ;;  %2061 = vmatprep.subr.mxu1 %v151_v17  ;;  %v129_v33 = vld [vmem:[%s3233_s3 + $0x80] sm:$0xff]  ;;  %v128_v34 = vld [vmem:[%s3233_s3 + $0x78] sm:$0xff]  ;;  %v126_v36 = vld [vmem:[%s3233_s3 + $0x68] sm:$0xff]  ;;  %v103_v11 = vsub.s32 0, %v2512_v10  ;;  %v109_v13 = vsub.s32 1, %v2512_v10 }
   0xd   :  { %170 = vmatpush1.msra.mxu0 %v146_v16  ;;  %2062 = vmatpush3.msra.mxu1 %v151_v17  ;;  %v133_v35 = vld [vmem:[%s3233_s3 + $0xa0] sm:$0xff]  ;;  %v130_v38 = vld [vmem:[%s3233_s3 + $0x88] sm:$0xff]  ;;  %v123_v39 = vld [vmem:[%s3233_s3 + $0x50] sm:$0xff] }
   0xe   :  { %171 = vmatprep.subr.mxu0 %v144_v18  ;;  %2063 = vmatprep.subr.mxu1 %v148_v20  ;;  %v125_v37 = vld [vmem:[%s3233_s3 + $0x60] sm:$0xff]  ;;  %v122_v40 = vld [vmem:[%s3233_s3 + $0x48] sm:$0xff]  ;;  %v127_v41 = vld [vmem:[%s3233_s3 + $0x70] sm:$0xff] }
   0xf   :  { %172 = vmatpush1.msra.mxu0 %v143_v19  ;;  %2064 = vmatpush3.msra.mxu1 %v148_v20  ;;  %v120_v42 = vld [vmem:[%s3233_s3 + $0x38] sm:$0xff]  ;;  %v119_v43 = vld [vmem:[%s3233_s3 + $0x30] sm:$0xff]  ;;  %v117_v45 = vld [vmem:[%s3233_s3 + $0x20] sm:$0xff] }
  0x10   :  { %173 = vmatprep.subr.mxu0 %v141_v21  ;;  %2065 = vmatprep.subr.mxu1 %v145_v23  ;;  %v124_v44 = vld [vmem:[%s3233_s3 + $0x58] sm:$0xff]  ;;  %v121_v47 = vld [vmem:[%s3233_s3 + $0x40] sm:$0xff]  ;;  %v114_v48 = vld [vmem:[%s3233_s3 + $0x8] sm:$0xff] }
  0x11   :  { %174 = vmatpush1.msra.mxu0 %v140_v22  ;;  %2066 = vmatpush3.msra.mxu1 %v145_v23  ;;  %v116_v46 = vld [vmem:[%s3233_s3 + $0x18] sm:$0xff]  ;;  %v113_v49 = vld [vmem:[%s3233_s3] sm:$0xff]  ;;  %v118_v51 = vld [vmem:[%s3233_s3 + $0x28] sm:$0xff] }
  0x12   :  { %175 = vmatprep.subr.mxu0 %v138_v24  ;;  %2067 = vmatprep.subr.mxu1 %v142_v27  ;;  %v115_v52 = vld [vmem:[%s3233_s3 + $0x10] sm:$0xff]  ;;  %v376_v53 = vld [vmem:[%s3232_s2 + $0xf8] sm:$0xff]  ;;  %v71_v12 = vld [vmem:[%s3234_s4 + $0x180] sm:$0xff] }
  0x13   :  { %176 = vmatpush1.msra.mxu0 %v137_v25  ;;  %2068 = vmatpush3.msra.mxu1 %v142_v27  ;;  %v408_v54 = vld [vmem:[%s3232_s2 + $0x1f8] sm:$0xff]  ;;  %v104_v16 = vrot.slane %v71_v12, %v103_v11  ;;  %v110_v20 = vrot.slane %v71_v12, %v109_v13  ;;  %v407_v27 = vld [vmem:[%s3232_s2 + $0x1f0] sm:$0xff] }
  0x14   :  { %177 = vmatprep.subr.mxu0 %v135_v26  ;;  %2069 = vmatprep.subr.mxu1 %v139_v30  ;;  %v360_v26 = vld [vmem:[%s3232_s2 + $0x78] sm:$0xff] }
  0x15   :  { %178 = vmatpush1.msra.mxu0 %v134_v28  ;;  %2070 = vmatpush3.msra.mxu1 %v139_v30  ;;  %v391_v28 = vld [vmem:[%s3232_s2 + $0x170] sm:$0xff]  ;;  %v406_v30 = vld [vmem:[%s3232_s2 + $0x1e8] sm:$0xff]  ;;  %v396_v9 = vld [vmem:[%s3232_s2 + $0x198] sm:$0xff] }
  0x16   :  { %179 = vmatprep.subr.mxu0 %v132_v29  ;;  %2071 = vmatprep.subr.mxu1 %v136_v32  ;;  %v359_v29 = vld [vmem:[%s3232_s2 + $0x70] sm:$0xff]  ;;  %v364_v11 = vld [vmem:[%s3232_s2 + $0x98] sm:$0xff] }
  0x17   :  { %180 = vmatpush1.msra.mxu0 %v131_v31  ;;  %2072 = vmatpush3.msra.mxu1 %v136_v32  ;;  %v374_v31 = vld [vmem:[%s3232_s2 + $0xe8] sm:$0xff]  ;;  %v380_v12 = vld [vmem:[%s3232_s2 + $0x118] sm:$0xff] }
  0x18   :  { %181 = vmatprep.subr.mxu0 %v129_v33  ;;  %2073 = vmatprep.subr.mxu1 %v133_v35  ;;  %v390_v32 = vld [vmem:[%s3232_s2 + $0x168] sm:$0xff]  ;;  %v348_v13 = vld [vmem:[%s3232_s2 + $0x18] sm:$0xff] }
  0x19   :  { %182 = vmatpush1.msra.mxu0 %v128_v34  ;;  %2074 = vmatpush3.msra.mxu1 %v133_v35  ;;  %v358_v33 = vld [vmem:[%s3232_s2 + $0x68] sm:$0xff]  ;;  %v405_v34 = vld [vmem:[%s3232_s2 + $0x1e0] sm:$0xff] }
  0x1a   :  { %183 = vmatprep.subr.mxu0 %v126_v36  ;;  %2075 = vmatprep.subr.mxu1 %v130_v38  ;;  %v373_v35 = vld [vmem:[%s3232_s2 + $0xe0] sm:$0xff] }
  0x1b   :  { %184 = vmatpush1.msra.mxu0 %v125_v37  ;;  %2076 = vmatpush3.msra.mxu1 %v130_v38  ;;  %v389_v36 = vld [vmem:[%s3232_s2 + $0x160] sm:$0xff]  ;;  %v404_v38 = vld [vmem:[%s3232_s2 + $0x1d8] sm:$0xff] }
  0x1c   :  { %185 = vmatprep.subr.mxu0 %v123_v39  ;;  %2077 = vmatprep.subr.mxu1 %v127_v41  ;;  %v357_v37 = vld [vmem:[%s3232_s2 + $0x60] sm:$0xff]  ;;  %v372_v39 = vld [vmem:[%s3232_s2 + $0xd8] sm:$0xff] }
  0x1d   :  { %186 = vmatpush1.msra.mxu0 %v122_v40  ;;  %2078 = vmatpush3.msra.mxu1 %v127_v41  ;;  %v388_v40 = vld [vmem:[%s3232_s2 + $0x158] sm:$0xff] }
  0x1e   :  { %187 = vmatprep.subr.mxu0 %v120_v42  ;;  %2079 = vmatprep.subr.mxu1 %v124_v44  ;;  %v356_v41 = vld [vmem:[%s3232_s2 + $0x58] sm:$0xff]  ;;  %v403_v42 = vld [vmem:[%s3232_s2 + $0x1d0] sm:$0xff] }
  0x1f   :  { %188 = vmatpush1.msra.mxu0 %v119_v43  ;;  %2080 = vmatpush3.msra.mxu1 %v124_v44  ;;  %v371_v43 = vld [vmem:[%s3232_s2 + $0xd0] sm:$0xff] }
  0x20   :  { %189 = vmatprep.subr.mxu0 %v117_v45  ;;  %2081 = vmatprep.subr.mxu1 %v121_v47  ;;  %v387_v44 = vld [vmem:[%s3232_s2 + $0x150] sm:$0xff] }
  0x21   :  { %190 = vmatpush1.msra.mxu0 %v116_v46  ;;  %2082 = vmatpush3.msra.mxu1 %v121_v47  ;;  %v355_v45 = vld [vmem:[%s3232_s2 + $0x50] sm:$0xff]  ;;  %v402_v46 = vld [vmem:[%s3232_s2 + $0x1c8] sm:$0xff] }
  0x22   :  { %191 = vmatprep.subr.mxu0 %v114_v48  ;;  %2083 = vmatprep.subr.mxu1 %v118_v51  ;;  %v370_v47 = vld [vmem:[%s3232_s2 + $0xc8] sm:$0xff] }
  0x23   :  { %192 = vmatpush1.msra.mxu0 %v113_v49  ;;  %2084 = vmatpush3.msra.mxu1 %v118_v51  ;;  %v386_v48 = vld [vmem:[%s3232_s2 + $0x148] sm:$0xff]  ;;  %v401_v51 = vld [vmem:[%s3232_s2 + $0x1c0] sm:$0xff] }
  0x24   :  { %2085 = vmatprep.subr.mxu1 %v115_v52  ;;  %1833 = vmatprep.subr.mxu0 %v376_v53  ;;  %v354_v49 = vld [vmem:[%s3232_s2 + $0x48] sm:$0xff]  ;;  %v385_v53 = vld [vmem:[%s3232_s2 + $0x140] sm:$0xff] }
  0x25   :  { %2086 = vmatpush3.msra.mxu1 %v115_v52  ;;  %v369_v52 = vld [vmem:[%s3232_s2 + $0xc0] sm:$0xff] }
  0x26   :  { %1871 = vmatprep.subr.mxu1 %v408_v54  ;;  %v353_v54 = vld [vmem:[%s3232_s2 + $0x40] sm:$0xff] }
  0x8b   :  { %v74_v55 = vpop.xlane.xlu0 %73  ;;  %v76_v56 = vpop.xlane.xlu1 %75 }
  0x8c   :  { %v77_v57 = vmul.f32 0.03125, %v74_v55  ;;  %v78_v58 = vmul.f32 0.03125, %v76_v56  ;;  %v400_v55 = vld [vmem:[%s3232_s2 + $0x1b8] sm:$0xff] }
  0x8d   :  { %v368_v56 = vld [vmem:[%s3232_s2 + $0xb8] sm:$0xff] }
  0x8e   :  { %v88_v59 = vmul.f32 %v78_v58, %v78_v58  ;;  %v87_v62 = vmul.f32 %v77_v57, %v77_v57  ;;  %v94_v14 = vsub.f32 %v2353_v1, %v78_v58  ;;  %v93_v15 = vsub.f32 %v2348_v0, %v77_v57  ;;  %v392_v1 = vld [vmem:[%s3232_s2 + $0x178] sm:$0xff]  ;;  %v375_v0 = vld [vmem:[%s3232_s2 + $0xf0] sm:$0xff] }
  0x8f   :  { %v82_v60 = vpop.xlane.xlu0 %81  ;;  %v84_v61 = vpop.xlane.xlu1 %83  ;;  %v384_v57 = vld [vmem:[%s3232_s2 + $0x138] sm:$0xff] }
  0x90   :  { %v85_v63 = vmul.f32 0.03125, %v82_v60  ;;  %v86_v2 = vmul.f32 0.03125, %v84_v61  ;;  %v352_v58 = vld [vmem:[%s3232_s2 + $0x38] sm:$0xff]  ;;  %v367_v60 = vld [vmem:[%s3232_s2 + $0xb0] sm:$0xff] }
  0x91   :  { %v383_v61 = vld [vmem:[%s3232_s2 + $0x130] sm:$0xff] }
  0x92   :  { %v89_v3 = vsub.f32 %v85_v63, %v87_v62  ;;  %v90_v4 = vsub.f32 %v86_v2, %v88_v59  ;;  %v399_v59 = vld [vmem:[%s3232_s2 + $0x1b0] sm:$0xff]  ;;  %v398_v63 = vld [vmem:[%s3232_s2 + $0x1a8] sm:$0xff] }
  0x93   :  { %v351_v62 = vld [vmem:[%s3232_s2 + $0x30] sm:$0xff]  ;;  %v366_v2 = vld [vmem:[%s3232_s2 + $0xa8] sm:$0xff] }
  0x94   :  { %v91_v5 = vmax.f32 %v89_v3, 0.0  ;;  %v92_v6 = vmax.f32 %v90_v4, 0.0  ;;  %v382_v3 = vld [vmem:[%s3232_s2 + $0x128] sm:$0xff] }
  0x95   :  { %v350_v4 = vld [vmem:[%s3232_s2 + $0x28] sm:$0xff] }
  0x96   :  { %v95_v7 = vadd.f32 1e-05, %v91_v5  ;;  %v96_v8 = vadd.f32 1e-05, %v92_v6  ;;  %v397_v5 = vld [vmem:[%s3232_s2 + $0x1a0] sm:$0xff] }
  0x97   :  { %v365_v6 = vld [vmem:[%s3232_s2 + $0xa0] sm:$0xff] }
  0x98   :  { %2247 = vrsqrt.f32 %v95_v7  ;;  %v381_v7 = vld [vmem:[%s3232_s2 + $0x120] sm:$0xff] }
  0x99   :  { %2249 = vrsqrt.f32 %v96_v8  ;;  %v349_v8 = vld [vmem:[%s3232_s2 + $0x20] sm:$0xff] }
  0xa5   :  { %v2248_v17 = vpop.eup %2247 }
  0xa6   :  { %v2250_v18 = vpop.eup %2249  ;;  %v99_v19 = vmul.f32 %v2248_v17, %v93_v15  ;;  %v363_v15 = vld [vmem:[%s3232_s2 + $0x90] sm:$0xff] }
  0xa7   :  { %v100_v21 = vmul.f32 %v2250_v18, %v94_v14  ;;  %v395_v14 = vld [vmem:[%s3232_s2 + $0x190] sm:$0xff]  ;;  %v394_v18 = vld [vmem:[%s3232_s2 + $0x188] sm:$0xff] }
  0xa8   :  { %v105_v22 = vmul.f32 %v104_v16, %v99_v19  ;;  %v347_v17 = vld [vmem:[%s3232_s2 + $0x10] sm:$0xff]  ;;  %v362_v19 = vld [vmem:[%s3232_s2 + $0x88] sm:$0xff] }
  0xa9   :  { %v106_v23 = vmul.f32 %v104_v16, %v100_v21  ;;  %v379_v16 = vld [vmem:[%s3232_s2 + $0x110] sm:$0xff]  ;;  %v378_v21 = vld [vmem:[%s3232_s2 + $0x108] sm:$0xff] }
  0xaa   :  { %v111_v24 = vadd.f32 %v110_v20, %v105_v22  ;;  %v361_v22 = vld [vmem:[%s3232_s2 + $0x80] sm:$0xff] }
  0xab   :  { %v112_v25 = vadd.f32 %v110_v20, %v106_v23  ;;  %v346_v20 = vld [vmem:[%s3232_s2 + $0x8] sm:$0xff]  ;;  %v393_v23 = vld [vmem:[%s3232_s2 + $0x180] sm:$0xff] }
  0xac   :  { %226 = vmatmul.mubr.f32.vlgmr.msra.gmra.mxu0 %v111_v24  ;;  %2087 = vmatprep.mubr.f32.mxu1 %v111_v24  ;;  %v345_v24 = vld [vmem:[%s3232_s2] sm:$0xff] }
  0xad   :  { %231 = vmatprep.mubr.f32.mxu0 %v2308_v50  ;;  %2088 = vmatmul.mubr.f32.vlgmr.msra.gmra.mxu1 %v112_v25 }
  0xae   :  { %1834 = vmatpush3.msra.mxu0 %v360_v26  ;;  %1872 = vmatpush3.msra.mxu1 %v392_v1  ;;  %v440_v26 = vld [vmem:[%s3232_s2 + $0x2f8] sm:$0xff] }
  0xaf   :  { %1835 = vmatprep.subr.mxu0 %v375_v0  ;;  %1873 = vmatprep.subr.mxu1 %v407_v27  ;;  %v472_v1 = vld [vmem:[%s3232_s2 + $0x3f8] sm:$0xff]  ;;  %v314_v0 = vld [vmem:[%s3231_s1 + $0x8] sm:$0xff] }
  0xb0   :  { %232 = vmatmul.mubr.f32.gmra.mxu0 %v112_v25  ;;  %1874 = vmatpush3.msra.mxu1 %v391_v28  ;;  %v377_v25 = vld [vmem:[%s3232_s2 + $0x100] sm:$0xff]  ;;  %v316_v27 = vld [vmem:[%s3231_s1 + $0x18] sm:$0xff] }
  0xb1   :  { %1836 = vmatpush3.msra.mxu0 %v359_v29  ;;  %1875 = vmatprep.subr.mxu1 %v406_v30  ;;  %v313_v28 = vld [vmem:[%s3231_s1] sm:$0xff]  ;;  %v315_v29 = vld [vmem:[%s3231_s1 + $0x10] sm:$0xff] }
  0xb2   :  { %1837 = vmatprep.subr.mxu0 %v374_v31  ;;  %1876 = vmatpush3.msra.mxu1 %v390_v32 }
  0xb3   :  { %1838 = vmatpush3.msra.mxu0 %v358_v33  ;;  %1877 = vmatprep.subr.mxu1 %v405_v34 }
  0xb4   :  { %1839 = vmatprep.subr.mxu0 %v373_v35  ;;  %1878 = vmatpush3.msra.mxu1 %v389_v36  ;;  %v424_v35 = vld [vmem:[%s3232_s2 + $0x278] sm:$0xff] }
  0xb5   :  { %1840 = vmatpush3.msra.mxu0 %v357_v37  ;;  %1879 = vmatprep.subr.mxu1 %v404_v38  ;;  %v456_v36 = vld [vmem:[%s3232_s2 + $0x378] sm:$0xff]  ;;  %v439_v38 = vld [vmem:[%s3232_s2 + $0x2f0] sm:$0xff] }
  0xb6   :  { %1841 = vmatprep.subr.mxu0 %v372_v39  ;;  %1880 = vmatpush3.msra.mxu1 %v388_v40  ;;  %v322_v39 = vld [vmem:[%s3231_s1 + $0x48] sm:$0xff]  ;;  %v324_v40 = vld [vmem:[%s3231_s1 + $0x58] sm:$0xff] }
  0xb7   :  { %1842 = vmatpush3.msra.mxu0 %v356_v41  ;;  %1881 = vmatprep.subr.mxu1 %v403_v42  ;;  %v471_v41 = vld [vmem:[%s3232_s2 + $0x3f0] sm:$0xff]  ;;  %v321_v42 = vld [vmem:[%s3231_s1 + $0x40] sm:$0xff] }
  0xb8   :  { %1843 = vmatprep.subr.mxu0 %v371_v43  ;;  %1882 = vmatpush3.msra.mxu1 %v387_v44  ;;  %v323_v43 = vld [vmem:[%s3231_s1 + $0x50] sm:$0xff] }
  0xb9   :  { %1844 = vmatpush3.msra.mxu0 %v355_v45  ;;  %1883 = vmatprep.subr.mxu1 %v402_v46  ;;  %v423_v45 = vld [vmem:[%s3232_s2 + $0x270] sm:$0xff] }
  0xba   :  { %1845 = vmatprep.subr.mxu0 %v370_v47  ;;  %1884 = vmatpush3.msra.mxu1 %v386_v48  ;;  %v455_v46 = vld [vmem:[%s3232_s2 + $0x370] sm:$0xff] }
  0xbb   :  { %1846 = vmatpush3.msra.mxu0 %v354_v49  ;;  %1885 = vmatprep.subr.mxu1 %v401_v51  ;;  %v438_v49 = vld [vmem:[%s3232_s2 + $0x2e8] sm:$0xff] }
  0xbc   :  { %1847 = vmatprep.subr.mxu0 %v369_v52  ;;  %1886 = vmatpush3.msra.mxu1 %v385_v53  ;;  %v470_v51 = vld [vmem:[%s3232_s2 + $0x3e8] sm:$0xff] }
  0xbd   :  { %1848 = vmatpush3.msra.mxu0 %v353_v54  ;;  %1887 = vmatprep.subr.mxu1 %v400_v55  ;;  %v318_v54 = vld [vmem:[%s3231_s1 + $0x28] sm:$0xff] }
  0xbe   :  { %1849 = vmatprep.subr.mxu0 %v368_v56  ;;  %1888 = vmatpush3.msra.mxu1 %v384_v57  ;;  %v422_v55 = vld [vmem:[%s3232_s2 + $0x268] sm:$0xff]  ;;  %v320_v57 = vld [vmem:[%s3231_s1 + $0x38] sm:$0xff] }
  0xbf   :  { %1850 = vmatpush3.msra.mxu0 %v352_v58  ;;  %1889 = vmatprep.subr.mxu1 %v399_v59  ;;  %v454_v56 = vld [vmem:[%s3232_s2 + $0x368] sm:$0xff]  ;;  %v437_v58 = vld [vmem:[%s3232_s2 + $0x2e0] sm:$0xff] }
  0xc0   :  { %1851 = vmatprep.subr.mxu0 %v367_v60  ;;  %1890 = vmatpush3.msra.mxu1 %v383_v61  ;;  %v469_v60 = vld [vmem:[%s3232_s2 + $0x3e0] sm:$0xff] }
  0xc1   :  { %1852 = vmatpush3.msra.mxu0 %v351_v62  ;;  %1891 = vmatprep.subr.mxu1 %v398_v63  ;;  %v421_v62 = vld [vmem:[%s3232_s2 + $0x260] sm:$0xff] }
  0xc2   :  { %1853 = vmatprep.subr.mxu0 %v366_v2  ;;  %1892 = vmatpush3.msra.mxu1 %v382_v3  ;;  %v453_v63 = vld [vmem:[%s3232_s2 + $0x360] sm:$0xff]  ;;  %v436_v2 = vld [vmem:[%s3232_s2 + $0x2d8] sm:$0xff] }
  0xc3   :  { %1854 = vmatpush3.msra.mxu0 %v350_v4  ;;  %1893 = vmatprep.subr.mxu1 %v397_v5  ;;  %v468_v3 = vld [vmem:[%s3232_s2 + $0x3d8] sm:$0xff] }
  0xc4   :  { %1855 = vmatprep.subr.mxu0 %v365_v6  ;;  %1894 = vmatpush3.msra.mxu1 %v381_v7  ;;  %v420_v4 = vld [vmem:[%s3232_s2 + $0x258] sm:$0xff]  ;;  %v435_v6 = vld [vmem:[%s3232_s2 + $0x2d0] sm:$0xff] }
  0xc5   :  { %1856 = vmatpush3.msra.mxu0 %v349_v8  ;;  %1895 = vmatprep.subr.mxu1 %v396_v9  ;;  %v452_v5 = vld [vmem:[%s3232_s2 + $0x358] sm:$0xff]  ;;  %v467_v7 = vld [vmem:[%s3232_s2 + $0x3d0] sm:$0xff] }
  0xc6   :  { %1857 = vmatprep.subr.mxu0 %v364_v11  ;;  %1896 = vmatpush3.msra.mxu1 %v380_v12  ;;  %v419_v8 = vld [vmem:[%s3232_s2 + $0x250] sm:$0xff]  ;;  %v434_v11 = vld [vmem:[%s3232_s2 + $0x2c8] sm:$0xff] }
  0xc7   :  { %1858 = vmatpush3.msra.mxu0 %v348_v13  ;;  %1897 = vmatprep.subr.mxu1 %v395_v14  ;;  %v451_v9 = vld [vmem:[%s3232_s2 + $0x350] sm:$0xff]  ;;  %v466_v12 = vld [vmem:[%s3232_s2 + $0x3c8] sm:$0xff] }
  0xc8   :  { %1859 = vmatprep.subr.mxu0 %v363_v15  ;;  %1898 = vmatpush3.msra.mxu1 %v379_v16  ;;  %v418_v13 = vld [vmem:[%s3232_s2 + $0x248] sm:$0xff]  ;;  %v433_v15 = vld [vmem:[%s3232_s2 + $0x2c0] sm:$0xff] }
  0xc9   :  { %1860 = vmatpush3.msra.mxu0 %v347_v17  ;;  %1899 = vmatprep.subr.mxu1 %v394_v18  ;;  %v450_v14 = vld [vmem:[%s3232_s2 + $0x348] sm:$0xff]  ;;  %v465_v16 = vld [vmem:[%s3232_s2 + $0x3c0] sm:$0xff] }
  0xca   :  { %1861 = vmatprep.subr.mxu0 %v362_v19  ;;  %1900 = vmatpush3.msra.mxu1 %v378_v21  ;;  %v417_v17 = vld [vmem:[%s3232_s2 + $0x240] sm:$0xff]  ;;  %v432_v19 = vld [vmem:[%s3232_s2 + $0x2b8] sm:$0xff] }
  0xcb   :  { %1862 = vmatpush3.msra.mxu0 %v346_v20  ;;  %1901 = vmatprep.subr.mxu1 %v393_v23  ;;  %v449_v18 = vld [vmem:[%s3232_s2 + $0x340] sm:$0xff]  ;;  %v464_v20 = vld [vmem:[%s3232_s2 + $0x3b8] sm:$0xff]  ;;  %v431_v23 = vld [vmem:[%s3232_s2 + $0x2b0] sm:$0xff] }
  0xcc   :  { %1863 = vmatprep.subr.mxu0 %v361_v22  ;;  %1902 = vmatpush3.msra.mxu1 %v377_v25  ;;  %v416_v21 = vld [vmem:[%s3232_s2 + $0x238] sm:$0xff]  ;;  %v415_v25 = vld [vmem:[%s3232_s2 + $0x230] sm:$0xff] }
  0xcd   :  { %1864 = vmatpush3.msra.mxu0 %v345_v24  ;;  %1947 = vmatprep.subr.mxu1 %v472_v1  ;;  %v448_v22 = vld [vmem:[%s3232_s2 + $0x338] sm:$0xff]  ;;  %v463_v24 = vld [vmem:[%s3232_s2 + $0x3b0] sm:$0xff]  ;;  %v430_v1 = vld [vmem:[%s3232_s2 + $0x2a8] sm:$0xff] }
  0xce   :  { %1909 = vmatprep.subr.mxu0 %v440_v26  ;;  %v447_v26 = vld [vmem:[%s3232_s2 + $0x330] sm:$0xff] }
 0x16c   :  { %v2726_v30 = vpop.f32.mrf.mxu0 }
 0x16d   :  { %v330_v31 = vmul.f32 %v314_v0, %v2726_v30  ;;  %v332_v32 = vmul.f32 %v316_v27, %v2726_v30  ;;  %v329_v33 = vmul.f32 %v313_v28, %v2726_v30  ;;  %v331_v34 = vmul.f32 %v315_v29, %v2726_v30  ;;  %v462_v0 = vld [vmem:[%s3232_s2 + $0x3a8] sm:$0xff]  ;;  %v429_v29 = vld [vmem:[%s3232_s2 + $0x2a0] sm:$0xff] }
 0x16e   :  { %v2738_v37 = vpop.f32.mrf.mxu0  ;;  %v334_v59 = vmul.f32 %v318_v54, %v2726_v30  ;;  %v336_v61 = vmul.f32 %v320_v57, %v2726_v30  ;;  %v414_v27 = vld [vmem:[%s3232_s2 + $0x228] sm:$0xff]  ;;  %v441_v54 = vld [vmem:[%s3232_s2 + $0x300] sm:$0xff] }
 0x16f   :  { %537 = vmatprep.mubr.f32.mxu0 %v330_v31  ;;  %612 = vmatprep.mubr.f32.mxu1 %v332_v32  ;;  %v446_v28 = vld [vmem:[%s3232_s2 + $0x328] sm:$0xff]  ;;  %v461_v31 = vld [vmem:[%s3232_s2 + $0x3a0] sm:$0xff] }
 0x170   :  { %v2758_v44 = vpop.f32.mrf.mxu0  ;;  %538 = vmatmul.mubr.f32.vlgmr.msra.gmra.mxu0 %v329_v33  ;;  %613 = vmatmul.mubr.f32.vlgmr.msra.gmra.mxu1 %v331_v34  ;;  %v413_v32 = vld [vmem:[%s3232_s2 + $0x220] sm:$0xff]  ;;  %v428_v34 = vld [vmem:[%s3232_s2 + $0x298] sm:$0xff] }
 0x171   :  { %1910 = vmatpush3.msra.mxu0 %v424_v35  ;;  %1948 = vmatpush3.msra.mxu1 %v456_v36  ;;  %v338_v47 = vmul.f32 %v322_v39, %v2758_v44  ;;  %v340_v48 = vmul.f32 %v324_v40, %v2758_v44  ;;  %v337_v52 = vmul.f32 %v321_v42, %v2758_v44  ;;  %v445_v33 = vld [vmem:[%s3232_s2 + $0x320] sm:$0xff]  ;;  %v460_v35 = vld [vmem:[%s3232_s2 + $0x398] sm:$0xff]  ;;  %v427_v39 = vld [vmem:[%s3232_s2 + $0x290] sm:$0xff] }
 0x172   :  { %1911 = vmatprep.subr.mxu0 %v439_v38  ;;  %1949 = vmatprep.subr.mxu1 %v471_v41  ;;  %v339_v53 = vmul.f32 %v323_v43, %v2758_v44  ;;  %v412_v36 = vld [vmem:[%s3232_s2 + $0x218] sm:$0xff]  ;;  %v459_v40 = vld [vmem:[%s3232_s2 + $0x390] sm:$0xff]  ;;  %v426_v43 = vld [vmem:[%s3232_s2 + $0x288] sm:$0xff] }
 0x173   :  { %1912 = vmatpush3.msra.mxu0 %v423_v45  ;;  %1950 = vmatpush3.msra.mxu1 %v455_v46  ;;  %v444_v38 = vld [vmem:[%s3232_s2 + $0x318] sm:$0xff]  ;;  %v411_v41 = vld [vmem:[%s3232_s2 + $0x210] sm:$0xff]  ;;  %v458_v45 = vld [vmem:[%s3232_s2 + $0x388] sm:$0xff] }
 0x174   :  { %542 = vmatprep.mubr.f32.mxu0 %v338_v47  ;;  %617 = vmatprep.mubr.f32.mxu1 %v340_v48  ;;  %v443_v42 = vld [vmem:[%s3232_s2 + $0x310] sm:$0xff]  ;;  %v410_v46 = vld [vmem:[%s3232_s2 + $0x208] sm:$0xff]  ;;  %v317_v48 = vld [vmem:[%s3231_s1 + $0x20] sm:$0xff] }
 0x175   :  { %1913 = vmatprep.subr.mxu0 %v438_v49  ;;  %1951 = vmatprep.subr.mxu1 %v470_v51  ;;  %v442_v47 = vld [vmem:[%s3232_s2 + $0x308] sm:$0xff]  ;;  %v425_v49 = vld [vmem:[%s3232_s2 + $0x280] sm:$0xff]  ;;  %v333_v57 = vmul.f32 %v317_v48, %v2726_v30 }
 0x176   :  { %543 = vmatmul.mubr.f32.gmra.mxu0 %v337_v52  ;;  %618 = vmatmul.mubr.f32.gmra.mxu1 %v339_v53  ;;  %v457_v51 = vld [vmem:[%s3232_s2 + $0x380] sm:$0xff]  ;;  %v319_v52 = vld [vmem:[%s3231_s1 + $0x30] sm:$0xff] }
 0x177   :  { %1914 = vmatpush3.msra.mxu0 %v422_v55  ;;  %1952 = vmatpush3.msra.mxu1 %v454_v56  ;;  %v409_v53 = vld [vmem:[%s3232_s2 + $0x200] sm:$0xff]  ;;  %v326_v55 = vld [vmem:[%s3231_s1 + $0x68] sm:$0xff]  ;;  %v328_v56 = vld [vmem:[%s3231_s1 + $0x78] sm:$0xff] }
 0x178   :  { %1915 = vmatprep.subr.mxu0 %v437_v58  ;;  %687 = vmatprep.mubr.f32.mxu0 %v334_v59  ;;  %v335_v58 = vmul.f32 %v319_v52, %v2726_v30  ;;  %v342_v59 = vmul.f32 %v326_v55, %v2758_v44 }
 0x179   :  { %1953 = vmatprep.subr.mxu1 %v469_v60  ;;  %762 = vmatprep.mubr.f32.mxu1 %v336_v61  ;;  %v325_v60 = vld [vmem:[%s3231_s1 + $0x60] sm:$0xff]  ;;  %v327_v61 = vld [vmem:[%s3231_s1 + $0x70] sm:$0xff]  ;;  %s2310_s1 = smov 64  }
 0x17a   :  { %1916 = vmatpush3.msra.mxu0 %v421_v62  ;;  %1954 = vmatpush3.msra.mxu1 %v453_v63  ;;  %v344_v62 = vmul.f32 %v328_v56, %v2758_v44  ;;  %v341_v63 = vmul.f32 %v325_v60, %v2758_v44 }
 0x17b   :  { %1917 = vmatprep.subr.mxu0 %v436_v2  ;;  %1955 = vmatprep.subr.mxu1 %v468_v3  ;;  %v343_v2 = vmul.f32 %v327_v61, %v2758_v44  ;;  %v2976_v3 = vpop.f32.mrf.mxu1 }
 0x17c   :  { %1918 = vmatpush3.msra.mxu0 %v420_v4  ;;  %1956 = vmatpush3.msra.mxu1 %v452_v5  ;;  %v235_v4 = vpop.f32.mrf.mxu0 }
 0x17d   :  { %1919 = vmatprep.subr.mxu0 %v435_v6  ;;  %1957 = vmatprep.subr.mxu1 %v467_v7  ;;  %v2984_v5 = vpop.f32.mrf.mxu1 }
 0x17e   :  { %1920 = vmatpush3.msra.mxu0 %v419_v8  ;;  %1958 = vmatpush3.msra.mxu1 %v451_v9 }
 0x17f   :  { %1921 = vmatprep.subr.mxu0 %v434_v11  ;;  %1959 = vmatprep.subr.mxu1 %v466_v12 }
 0x180   :  { %1922 = vmatpush3.msra.mxu0 %v418_v13  ;;  %1960 = vmatpush3.msra.mxu1 %v450_v14 }
 0x181   :  { %1923 = vmatprep.subr.mxu0 %v433_v15  ;;  %1961 = vmatprep.subr.mxu1 %v465_v16 }
 0x182   :  { %1924 = vmatpush3.msra.mxu0 %v417_v17  ;;  %1962 = vmatpush3.msra.mxu1 %v449_v18 }
 0x183   :  { %1925 = vmatprep.subr.mxu0 %v432_v19  ;;  %1963 = vmatprep.subr.mxu1 %v464_v20 }
 0x184   :  { %1926 = vmatpush3.msra.mxu0 %v416_v21  ;;  %1964 = vmatpush3.msra.mxu1 %v448_v22 }
 0x185   :  { %1927 = vmatprep.subr.mxu0 %v431_v23  ;;  %1965 = vmatprep.subr.mxu1 %v463_v24 }
 0x186   :  { %1928 = vmatpush3.msra.mxu0 %v415_v25  ;;  %1966 = vmatpush3.msra.mxu1 %v447_v26 }
 0x187   :  { %1929 = vmatprep.subr.mxu0 %v430_v1  ;;  %1967 = vmatprep.subr.mxu1 %v462_v0 }
 0x188   :  { %1930 = vmatpush3.msra.mxu0 %v414_v27  ;;  %1968 = vmatpush3.msra.mxu1 %v446_v28 }
 0x189   :  { %1931 = vmatprep.subr.mxu0 %v429_v29  ;;  %1969 = vmatprep.subr.mxu1 %v461_v31 }
 0x18a   :  { %1932 = vmatpush3.msra.mxu0 %v413_v32  ;;  %1970 = vmatpush3.msra.mxu1 %v445_v33 }
 0x18b   :  { %1933 = vmatprep.subr.mxu0 %v428_v34  ;;  %1971 = vmatprep.subr.mxu1 %v460_v35 }
 0x18c   :  { %1934 = vmatpush3.msra.mxu0 %v412_v36  ;;  %1972 = vmatpush3.msra.mxu1 %v444_v38 }
 0x18d   :  { %1935 = vmatprep.subr.mxu0 %v427_v39  ;;  %1973 = vmatprep.subr.mxu1 %v459_v40 }
 0x18e   :  { %1936 = vmatpush3.msra.mxu0 %v411_v41  ;;  %1974 = vmatpush3.msra.mxu1 %v443_v42 }
 0x18f   :  { %1937 = vmatprep.subr.mxu0 %v426_v43  ;;  %1975 = vmatprep.subr.mxu1 %v458_v45 }
 0x190   :  { %1938 = vmatpush3.msra.mxu0 %v410_v46  ;;  %1976 = vmatpush3.msra.mxu1 %v442_v47 }
 0x191   :  { %1939 = vmatprep.subr.mxu0 %v425_v49  ;;  %1977 = vmatprep.subr.mxu1 %v457_v51 }
 0x192   :  { %1940 = vmatpush3.msra.mxu0 %v409_v53  ;;  %1978 = vmatpush3.msra.mxu1 %v441_v54 }
 0x193   :  { %688 = vmatmul.mubr.f32.vlgmr.msra.gmra.mxu0 %v333_v57  ;;  %763 = vmatmul.mubr.f32.vlgmr.msra.gmra.mxu1 %v335_v58 }
 0x194   :  { %2090 = vmatprep.subr.mxu1 %v2308_v50  ;;  %692 = vmatprep.mubr.f32.mxu0 %v342_v59 }
 0x195   :  { %767 = vmatprep.mubr.f32.mxu1 %v344_v62  ;;  %2091 = vmatpush3.xpose.msk.msra.mxu1 %vm773_vm0, %v2738_v37 }
 0x196   :  { %2095 = vmatprep.subr.mxu1 %v2308_v50 }
 0x197   :  { %693 = vmatmul.mubr.f32.gmra.mxu0 %v341_v63  ;;  %768 = vmatmul.mubr.f32.gmra.mxu1 %v343_v2 }
 0x198   :  { %2092 = vmatprep.mubr.msk.f32.mxu1 %vm2309_vm1, %v2308_v50 }
 0x19b   :  { %2093 = vmatmul.mubr.msk.f32.vlgmr.msra.gmra.mxu1 %vm773_vm0, %v2726_v30 }
 0x19c   :  { %2096 = vmatpush3.xpose.msk.msra.mxu1 %vm773_vm0, %v235_v4  ;;  %2097 = vmatprep.mubr.msk.f32.mxu1 %vm2309_vm1, %v2308_v50 }
 0x19d   :  { %2100 = vmatprep.subr.mxu1 %v2308_v50 }
 0x19f   :  { %2098 = vmatmul.mubr.msk.f32.vlgmr.msra.gmra.mxu1 %vm773_vm0, %v2758_v44 }
 0x1a0   :  { %2101 = vmatpush3.msra.mxu1 %v2984_v5  ;;  %2102 = vmatprep.mubr.msk.f32.mxu1 %vm2309_vm1, %v2308_v50 }
 0x1a1   :  { %2105 = vmatprep.subr.mxu1 %v2308_v50 }
 0x230   :  { %v1865_v6 = vpop.f32.mrf.mxu0  ;;  %v1903_v7 = vpop.f32.mrf.mxu1 }
 0x232   :  { %v1866_v8 = vpop.f32.mrf.mxu0  ;;  %v1904_v9 = vpop.f32.mrf.mxu1 }
 0x233   :  { %v1867_v15 = vadd.f32 %v1866_v8, %v1865_v6  ;;  %v1905_v16 = vadd.f32 %v1904_v9, %v1903_v7 }
 0x235   :  { %v615_v21 = vadd.f32 %v1905_v16, %v1867_v15 }
 0x236   :  { %v1868_v11 = vpop.f32.mrf.mxu0  ;;  %v1906_v12 = vpop.f32.mrf.mxu1 }
 0x238   :  { %v1869_v13 = vpop.f32.mrf.mxu0  ;;  %v1907_v14 = vpop.f32.mrf.mxu1 }
 0x239   :  { %v1870_v22 = vadd.f32 %v1869_v13, %v1868_v11  ;;  %v1908_v23 = vadd.f32 %v1907_v14, %v1906_v12 }
 0x23b   :  { %v620_v29 = vadd.f32 %v1908_v23, %v1870_v22 }
 0x253   :  { %v1941_v17 = vpop.f32.mrf.mxu0  ;;  %v1979_v18 = vpop.f32.mrf.mxu1 }
 0x255   :  { %v1942_v19 = vpop.f32.mrf.mxu0  ;;  %v1980_v20 = vpop.f32.mrf.mxu1 }
 0x256   :  { %v1943_v24 = vadd.f32 %v1942_v19, %v1941_v17  ;;  %v1981_v0 = vadd.f32 %v1980_v20, %v1979_v18 }
 0x257   :  { %v1944_v25 = vpop.f32.mrf.mxu0  ;;  %v1982_v26 = vpop.f32.mrf.mxu1 }
 0x258   :  { %v690_v1 = vadd.f32 %v1943_v24, %v615_v21 }
 0x259   :  { %v1945_v27 = vpop.f32.mrf.mxu0  ;;  %v1983_v28 = vpop.f32.mrf.mxu1 }
 0x25a   :  { %v1946_v31 = vadd.f32 %v1945_v27, %v1944_v25  ;;  %v765_v32 = vadd.f32 %v1981_v0, %v690_v1  ;;  %v1984_v35 = vadd.f32 %v1983_v28, %v1982_v26 }
 0x25b   :  { %v846_v33 = vpop.f32.mrf.mxu1 }
 0x25c   :  { %v695_v34 = vadd.f32 %v1946_v31, %v620_v29  ;;  %v847_v36 = vadd.f32 %v846_v33, %v765_v32 }
 0x25d   :  { %v2094_v38 = vpop.f32.mrf.mxu1 }
 0x25e   :  { %v770_v39 = vadd.f32 %v1984_v35, %v695_v34  ;;  %v927_v40 = vsel %vm926_vm2, %v847_v36, -inf  ;;  %v53_v35 = vld [vmem:[%s3234_s4 + $0xf0] sm:$0xff]  ;;  %v50_v38 = vld [vmem:[%s3234_s4 + $0xd8] sm:$0xff] }
 0x25f   :  { %v922_v41 = vpop.f32.mrf.mxu1  ;;  %928 = vmax.xlane.f32.xlu0 %v927_v40  ;;  %v48_v40 = vld [vmem:[%s3234_s4 + $0xc8] sm:$0xff] }
 0x260   :  { %v923_v42 = vadd.f32 %v922_v41, %v770_v39  ;;  %v47_v41 = vld [vmem:[%s3234_s4 + $0xc0] sm:$0xff] }
 0x261   :  { %v2099_v43 = vpop.f32.mrf.mxu1 }
 0x262   :  { %v930_v45 = vsel %vm926_vm2, %v923_v42, -inf  ;;  %v45_v43 = vld [vmem:[%s3234_s4 + $0xb0] sm:$0xff] }
 0x263   :  { %931 = vmax.xlane.f32.xlu1 %v930_v45  ;;  %v44_v45 = vld [vmem:[%s3234_s4 + $0xa8] sm:$0xff] }
 0x274   :  { %1095 = vrot.lane.b32.xlu1 %v2726_v30, %s2310_s1 }
 0x278   :  { %1179 = vrot.lane.b32.xlu1 %v235_v4, %s2310_s1 }
 0x2e8   :  { %v929_v46 = vpop.xlane.xlu0 %928 }
 0x2e9   :  { %v933_v47 = vsub.f32 %v847_v36, %v929_v46  ;;  %v52_v36 = vld [vmem:[%s3234_s4 + $0xe8] sm:$0xff]  ;;  %v43_v46 = vld [vmem:[%s3234_s4 + $0xa0] sm:$0xff] }
 0x2eb   :  { %v935_v48 = vmul.f32 1.442695, %v933_v47  ;;  %v42_v47 = vld [vmem:[%s3234_s4 + $0x98] sm:$0xff] }
 0x2ec   :  { %v932_v49 = vpop.xlane.xlu1 %931 }
 0x2ed   :  { %2251 = vpow2.f32 %v935_v48  ;;  %v934_v51 = vsub.f32 %v923_v42, %v932_v49  ;;  %v46_v42 = vld [vmem:[%s3234_s4 + $0xb8] sm:$0xff]  ;;  %v41_v48 = vld [vmem:[%s3234_s4 + $0x90] sm:$0xff]  ;;  %v40_v49 = vld [vmem:[%s3234_s4 + $0x88] sm:$0xff] }
 0x2ef   :  { %v937_v52 = vmul.f32 1.442695, %v934_v51  ;;  %v39_v51 = vld [vmem:[%s3234_s4 + $0x80] sm:$0xff] }
 0x2f0   :  { %v1096_v30 = vpop.permute.xlu1 %1095 }
 0x2f1   :  { %2253 = vpow2.f32 %v937_v52 }
 0x2f4   :  { %v1180_v57 = vpop.permute.xlu1 %1179 }
 0x2fa   :  { %v2252_v53 = vpop.eup %2251 }
 0x2fb   :  { %v939_v54 = vsel %vm926_vm2, %v2252_v53, 0.0 }
 0x2fc   :  { %940 = vadd.xlane.f32.xlu0 %v939_v54 }
 0x2fe   :  { %v2254_v55 = vpop.eup %2253 }
 0x2ff   :  { %v942_v56 = vsel %vm926_vm2, %v2254_v55, 0.0 }
 0x300   :  { %943 = vadd.xlane.f32.xlu1 %v942_v56 }
 0x311   :  { %1177 = vrot.lane.b32.xlu1 %v2758_v44, %s2310_s1 }
 0x312   :  { %1097 = vrot.lane.b32.xlu0 %v2738_v37, %s2310_s1 }
 0x315   :  { %1182 = vrot.lane.b32.xlu1 %v770_v39, %s2311_s21  ;;  %v49_v39 = vld [vmem:[%s3234_s4 + $0xd0] sm:$0xff] }
 0x316   :  { %1100 = vrot.lane.b32.xlu0 %v765_v32, %s2311_s21 }
 0x385   :  { %v941_v58 = vpop.xlane.xlu0 %940 }
 0x386   :  { %2255 = vrcp.f32 %v941_v58 }
 0x389   :  { %v944_v59 = vpop.xlane.xlu1 %943  ;;  %v1098_v44 = vpop.permute.xlu0 %1097 }
 0x38a   :  { %2257 = vrcp.f32 %v944_v59 }
 0x38d   :  { %v1178_v63 = vpop.permute.xlu1 %1177  ;;  %v1101_v8 = vpop.permute.xlu0 %1100 }
 0x391   :  { %v1183_v14 = vpop.permute.xlu1 %1182 }
 0x393   :  { %v2256_v60 = vpop.eup %2255 }
 0x394   :  { %v947_v61 = vmul.f32 %v2256_v60, %v2252_v53 }
 0x396   :  { %2103 = vmatmul.mubr.msk.f32.vlgmr.msra.gmra.mxu1 %vm926_vm2, %v947_v61  ;;  %v1524_v61 = vsub.s32 2, %v2512_v10 }
 0x397   :  { %v2258_v62 = vpop.eup %2257  ;;  %2106 = vmatpush3.msra.mxu1 %v2976_v3  ;;  %2107 = vmatprep.mubr.msk.f32.mxu1 %vm2309_vm1, %v2308_v50 }
 0x398   :  { %2110 = vmatprep.subr.mxu1 %v2308_v50  ;;  %v948_v37 = vmul.f32 %v2258_v62, %v2254_v55  ;;  %v3095_v62 = vld [vmem:[%s3234_s4 + $0x180] sm:$0xff] }
 0x39a   :  { %2108 = vmatmul.mubr.msk.f32.vlgmr.msra.gmra.mxu1 %vm926_vm2, %v948_v37  ;;  %v1525_v37 = vrot.slane %v3095_v62, %v1524_v61  ;;  %v66_v61 = vld [vmem:[%s3234_s4 + $0x158] sm:$0xff] }
 0x39b   :  { %2111 = vmatpush3.xpose.msk.msra.mxu1 %vm773_vm0, %v1098_v44  ;;  %2112 = vmatprep.mubr.msk.f32.mxu1 %vm2309_vm1, %v2308_v50 }
 0x39c   :  { %2115 = vmatprep.subr.mxu1 %v2308_v50 }
 0x39e   :  { %2113 = vmatmul.mubr.msk.f32.vlgmr.msra.gmra.mxu1 %vm773_vm0, %v1096_v30 }
 0x39f   :  { %2116 = vmatpush3.xpose.msk.msra.mxu1 %vm773_vm0, %v1180_v57  ;;  %2117 = vmatprep.mubr.msk.f32.mxu1 %vm2309_vm1, %v2308_v50 }
 0x3a0   :  { %2120 = vmatprep.subr.mxu1 %v2308_v50 }
 0x3a2   :  { %2118 = vmatmul.mubr.msk.f32.vlgmr.msra.gmra.mxu1 %vm773_vm0, %v1178_v63  ;;  %v2284_v63 = vld [vmem:[%s3230_s0 + $0x8] sm:$0xff] }
 0x3a3   :  { %2122 = vmatprep.mubr.msk.f32.mxu1 %vm2309_vm1, %v2308_v50 }
 0x456   :  { %v3021_v2 = vpop.f32.mrf.mxu1 }
 0x458   :  { %v2104_v4 = vpop.f32.mrf.mxu1 }
 0x45a   :  { %v3023_v6 = vpop.f32.mrf.mxu1 }
 0x45c   :  { %v2109_v7 = vpop.f32.mrf.mxu1 }
 0x45e   :  { %v1173_v9 = vpop.f32.mrf.mxu1 }
 0x45f   :  { %v1174_v11 = vadd.f32 %v1173_v9, %v1101_v8 }
 0x460   :  { %v2114_v12 = vpop.f32.mrf.mxu1 }
 0x461   :  { %v1259_v13 = vsel %vm926_vm2, %v1174_v11, -inf }
 0x462   :  { %v1255_v15 = vpop.f32.mrf.mxu1  ;;  %1260 = vmax.xlane.f32.xlu0 %v1259_v13  ;;  %v38_v13 = vld [vmem:[%s3234_s4 + $0x78] sm:$0xff] }
 0x463   :  { %v1256_v16 = vadd.f32 %v1255_v15, %v1183_v14  ;;  %v37_v14 = vld [vmem:[%s3234_s4 + $0x70] sm:$0xff]  ;;  %v36_v15 = vld [vmem:[%s3234_s4 + $0x68] sm:$0xff] }
 0x464   :  { %v2119_v17 = vpop.f32.mrf.mxu1 }
 0x465   :  { %v1262_v18 = vsel %vm926_vm2, %v1256_v16, -inf  ;;  %v34_v17 = vld [vmem:[%s3234_s4 + $0x58] sm:$0xff] }
 0x466   :  { %1263 = vmax.xlane.f32.xlu1 %v1262_v18  ;;  %v33_v18 = vld [vmem:[%s3234_s4 + $0x50] sm:$0xff] }
 0x477   :  { %1359 = vrot.lane.b32.xlu1 %v2976_v3, %s2310_s1 }
 0x4eb   :  { %v1261_v19 = vpop.xlane.xlu0 %1260 }
 0x4ec   :  { %v1265_v20 = vsub.f32 %v1174_v11, %v1261_v19  ;;  %v32_v19 = vld [vmem:[%s3234_s4 + $0x48] sm:$0xff] }
 0x4ee   :  { %v1267_v21 = vmul.f32 1.442695, %v1265_v20  ;;  %v31_v20 = vld [vmem:[%s3234_s4 + $0x40] sm:$0xff] }
 0x4ef   :  { %v1264_v22 = vpop.xlane.xlu1 %1263 }
 0x4f0   :  { %2259 = vpow2.f32 %v1267_v21  ;;  %v1266_v23 = vsub.f32 %v1256_v16, %v1264_v22  ;;  %v35_v16 = vld [vmem:[%s3234_s4 + $0x60] sm:$0xff]  ;;  %v30_v21 = vld [vmem:[%s3234_s4 + $0x38] sm:$0xff]  ;;  %v29_v22 = vld [vmem:[%s3234_s4 + $0x30] sm:$0xff] }
 0x4f2   :  { %v1269_v24 = vmul.f32 1.442695, %v1266_v23  ;;  %v28_v23 = vld [vmem:[%s3234_s4 + $0x28] sm:$0xff] }
 0x4f3   :  { %v1360_v32 = vpop.permute.xlu1 %1359 }
 0x4f4   :  { %2261 = vpow2.f32 %v1269_v24  ;;  %v27_v24 = vld [vmem:[%s3234_s4 + $0x20] sm:$0xff] }
 0x4fd   :  { %v2260_v25 = vpop.eup %2259 }
 0x4fe   :  { %v1271_v26 = vsel %vm926_vm2, %v2260_v25, 0.0 }
 0x4ff   :  { %1272 = vadd.xlane.f32.xlu0 %v1271_v26  ;;  %v25_v26 = vld [vmem:[%s3234_s4 + $0x10] sm:$0xff] }
 0x501   :  { %v2262_v1 = vpop.eup %2261 }
 0x502   :  { %v1274_v0 = vsel %vm926_vm2, %v2262_v1, 0.0 }
 0x503   :  { %1275 = vadd.xlane.f32.xlu0 %v1274_v0  ;;  %v23_v0 = vld [vmem:[%s3234_s4] sm:$0xff] }
 0x519   :  { %1282 = vrot.lane.b32.xlu0 %v2984_v5, %s2310_s1  ;;  %v54_v5 = vld [vmem:[%s3234_s4 + $0xf8] sm:$0xff] }
 0x51a   :  { %2130 = vmatprep.subr.mxu0 %v54_v5 }
 0x51b   :  { %2131 = vmatpush3.msra.mxu0 %v54_v5 }
 0x51c   :  { %2132 = vmatprep.subr.mxu0 %v53_v35 }
 0x51d   :  { %2133 = vmatpush3.msra.mxu0 %v53_v35 }
 0x51e   :  { %2134 = vmatprep.subr.mxu0 %v52_v36 }
 0x51f   :  { %2135 = vmatpush3.msra.mxu0 %v52_v36 }
 0x588   :  { %v1273_v3 = vpop.xlane.xlu0 %1272 }
 0x589   :  { %2263 = vrcp.f32 %v1273_v3 }
 0x58c   :  { %v1276_v27 = vpop.xlane.xlu0 %1275 }
 0x58d   :  { %2265 = vrcp.f32 %v1276_v27 }
 0x590   :  { %v1283_v28 = vpop.permute.xlu0 %1282 }
 0x591   :  { %2121 = vmatpush3.msra.mxu1 %v1283_v28 }
 0x592   :  { %2125 = vmatprep.subr.mxu1 %v2308_v50 }
 0x596   :  { %v2264_v29 = vpop.eup %2263 }
 0x597   :  { %v1279_v31 = vmul.f32 %v2264_v29, %v2260_v25  ;;  %v26_v25 = vld [vmem:[%s3234_s4 + $0x18] sm:$0xff] }
 0x599   :  { %2123 = vmatmul.mubr.msk.f32.vlgmr.msra.gmra.mxu1 %vm926_vm2, %v1279_v31 }
 0x59a   :  { %v2266_v33 = vpop.eup %2265  ;;  %2126 = vmatpush3.msra.mxu1 %v1360_v32  ;;  %2127 = vmatprep.mubr.msk.f32.mxu1 %vm2309_vm1, %v2308_v50  ;;  %v51_v50 = vld [vmem:[%s3234_s4 + $0xe0] sm:$0xff] }
 0x59b   :  { %v1280_v34 = vmul.f32 %v2266_v33, %v2262_v1  ;;  %2136 = vmatprep.subr.mxu0 %v51_v50  ;;  %2165 = vmatprep.subr.mxu1 %v38_v13  ;;  %v24_v1 = vld [vmem:[%s3234_s4 + $0x8] sm:$0xff] }
 0x59c   :  { %2137 = vmatpush3.msra.mxu0 %v51_v50 }
 0x59d   :  { %2128 = vmatmul.mubr.msk.f32.vlgmr.msra.gmra.mxu1 %vm926_vm2, %v1280_v34  ;;  %2138 = vmatprep.subr.mxu0 %v50_v38 }
 0x59e   :  { %2139 = vmatpush3.msra.mxu0 %v50_v38  ;;  %2166 = vmatpush3.msra.mxu1 %v38_v13  ;;  %v56_v13 = vld [vmem:[%s3234_s4 + $0x108] sm:$0xff] }
 0x59f   :  { %2140 = vmatprep.subr.mxu0 %v49_v39  ;;  %2167 = vmatprep.subr.mxu1 %v37_v14 }
 0x5a0   :  { %2141 = vmatpush3.msra.mxu0 %v49_v39  ;;  %2168 = vmatpush3.msra.mxu1 %v37_v14  ;;  %v55_v14 = vld [vmem:[%s3234_s4 + $0x100] sm:$0xff] }
 0x5a1   :  { %2142 = vmatprep.subr.mxu0 %v48_v40  ;;  %2169 = vmatprep.subr.mxu1 %v36_v15 }
 0x5a2   :  { %2143 = vmatpush3.msra.mxu0 %v48_v40  ;;  %2170 = vmatpush3.msra.mxu1 %v36_v15  ;;  %v1812_v15 = vld [vmem:[%s3234_s4 + $0x188] ss:$0 sm:$0xff] }
 0x5a3   :  { %2144 = vmatprep.subr.mxu0 %v47_v41  ;;  %2171 = vmatprep.subr.mxu1 %v35_v16 }
 0x5a4   :  { %2145 = vmatpush3.msra.mxu0 %v47_v41  ;;  %2172 = vmatpush3.msra.mxu1 %v35_v16 }
 0x5a5   :  { %2146 = vmatprep.subr.mxu0 %v46_v42  ;;  %2173 = vmatprep.subr.mxu1 %v34_v17 }
 0x5a6   :  { %2147 = vmatpush3.msra.mxu0 %v46_v42  ;;  %2174 = vmatpush3.msra.mxu1 %v34_v17  ;;  %v1558_v42 = vsub.s32 3, %v2512_v10 }
 0x5a7   :  { %2148 = vmatprep.subr.mxu0 %v45_v43  ;;  %2175 = vmatprep.subr.mxu1 %v33_v18 }
 0x5a8   :  { %2149 = vmatpush3.msra.mxu0 %v45_v43  ;;  %2176 = vmatpush3.msra.mxu1 %v33_v18  ;;  %v1564_v43 = vsub.s32 4, %v2512_v10 }
 0x5a9   :  { %2150 = vmatprep.subr.mxu0 %v44_v45  ;;  %2177 = vmatprep.subr.mxu1 %v32_v19 }
 0x5aa   :  { %2151 = vmatpush3.msra.mxu0 %v44_v45  ;;  %2178 = vmatpush3.msra.mxu1 %v32_v19 }
 0x5ab   :  { %2152 = vmatprep.subr.mxu0 %v43_v46  ;;  %2179 = vmatprep.subr.mxu1 %v31_v20 }
 0x5ac   :  { %2153 = vmatpush3.msra.mxu0 %v43_v46  ;;  %2180 = vmatpush3.msra.mxu1 %v31_v20  ;;  %v1559_v46 = vrot.slane %v3095_v62, %v1558_v42 }
 0x5ad   :  { %2154 = vmatprep.subr.mxu0 %v42_v47  ;;  %2181 = vmatprep.subr.mxu1 %v30_v21 }
 0x5ae   :  { %2155 = vmatpush3.msra.mxu0 %v42_v47  ;;  %2182 = vmatpush3.msra.mxu1 %v30_v21 }
 0x5af   :  { %2156 = vmatprep.subr.mxu0 %v41_v48  ;;  %2183 = vmatprep.subr.mxu1 %v29_v22 }
 0x5b0   :  { %2157 = vmatpush3.msra.mxu0 %v41_v48  ;;  %2184 = vmatpush3.msra.mxu1 %v29_v22 }
 0x5b1   :  { %2158 = vmatprep.subr.mxu0 %v40_v49  ;;  %2185 = vmatprep.subr.mxu1 %v28_v23 }
 0x5b2   :  { %2159 = vmatpush3.msra.mxu0 %v40_v49  ;;  %2186 = vmatpush3.msra.mxu1 %v28_v23  ;;  %v1565_v49 = vrot.slane %v3095_v62, %v1564_v43 }
 0x5b3   :  { %2160 = vmatprep.subr.mxu0 %v39_v51  ;;  %2187 = vmatprep.subr.mxu1 %v27_v24 }
 0x5b4   :  { %2161 = vmatpush3.msra.mxu0 %v39_v51  ;;  %2188 = vmatpush3.msra.mxu1 %v27_v24 }
 0x5b5   :  { %2189 = vmatprep.subr.mxu1 %v26_v25 }
 0x5b6   :  { %2190 = vmatpush3.msra.mxu1 %v26_v25 }
 0x5b7   :  { %2191 = vmatprep.subr.mxu1 %v25_v26 }
 0x5b8   :  { %2192 = vmatpush3.msra.mxu1 %v25_v26 }
 0x5b9   :  { %2193 = vmatprep.subr.mxu1 %v24_v1 }
 0x5ba   :  { %2194 = vmatpush3.msra.mxu1 %v24_v1 }
 0x5bb   :  { %2195 = vmatprep.subr.mxu1 %v23_v0 }
 0x5bc   :  { %2196 = vmatpush3.msra.mxu1 %v23_v0 }
 0x659   :  { %v1354_v52 = vpop.f32.mrf.mxu1 }
 0x65b   :  { %v2124_v53 = vpop.f32.mrf.mxu1 }
 0x65d   :  { %v1431_v54 = vpop.f32.mrf.mxu1 }
 0x65e   :  { %v2242_v55 = vpack.i.bf16 %v1431_v54, %v1354_v52 }
 0x65f   :  { %v2129_v56 = vpop.f32.mrf.mxu1 }
 0x660   :  { %2243 = vrot.lane.b32.xlu1 %v2242_v55, %s2310_s1 }
 0x6d2   :  { %v2244_v30 = vpop.permute.xlu1 %2243 }
 0x6d3   :  { %v2246_v57 = vunpack.i.h.bf16 %v2244_v30  ;;  %v2245_v58 = vunpack.i.l.bf16 %v2244_v30 }
 0x6d5   :  { %v1443_v59 = vsel %vm773_vm0, %v3021_v2, %v2245_v58  ;;  %v1444_v60 = vsel %vm773_vm0, %v3023_v6, %v2246_v57  ;;  %v2285_v6 = vld [vmem:[%s3230_s0] sm:$0xff]  ;;  %v70_v57 = vld [vmem:[%s3234_s4 + $0x178] sm:$0xff]  ;;  %v69_v58 = vld [vmem:[%s3234_s4 + $0x170] sm:$0xff] }
 0x6d6   :  { %2162 = vmatprep.mubr.f32.mxu0 %v1443_v59  ;;  %2200 = vmatprep.subr.mxu0 %v70_v57  ;;  %v68_v59 = vld [vmem:[%s3234_s4 + $0x168] sm:$0xff] }
 0x6d7   :  { %2163 = vmatmul.mubr.f32.vlgmr.msra.gmra.mxu0 %v1444_v60  ;;  %v67_v60 = vld [vmem:[%s3234_s4 + $0x160] sm:$0xff] }
 0x6d8   :  { %2201 = vmatpush3.msra.mxu0 %v70_v57 }
 0x6d9   :  { %2202 = vmatprep.subr.mxu0 %v69_v58 }
 0x6da   :  { %2203 = vmatpush3.msra.mxu0 %v69_v58 }
 0x6db   :  { %2204 = vmatprep.subr.mxu0 %v68_v59 }
 0x6dc   :  { %2205 = vmatpush3.msra.mxu0 %v68_v59 }
 0x6dd   :  { %2206 = vmatprep.subr.mxu0 %v67_v60 }
 0x6de   :  { %2207 = vmatpush3.msra.mxu0 %v67_v60 }
 0x6df   :  { %2208 = vmatprep.subr.mxu0 %v66_v61 }
 0x6e0   :  { %2209 = vmatpush3.msra.mxu0 %v66_v61 }
 0x797   :  { %v2164_v44 = vpop.f32.mrf.mxu0 }
 0x798   :  { %v1521_v2 = vadd.f32 %v2284_v63, %v2164_v44  ;;  %v64_v44 = vld [vmem:[%s3234_s4 + $0x148] sm:$0xff]  ;;  %v63_v63 = vld [vmem:[%s3234_s4 + $0x140] sm:$0xff] }
 0x799   :  { %v1511_v4 = vpop.f32.mrf.mxu0 }
 0x79a   :  { %v3101_v7 = vadd.f32 %v1525_v37, %v1521_v2  ;;  %v1520_v8 = vadd.f32 %v2285_v6, %v1511_v4  ;;  %v62_v2 = vld [vmem:[%s3234_s4 + $0x138] sm:$0xff]  ;;  %v61_v4 = vld [vmem:[%s3234_s4 + $0x130] sm:$0xff]  ;;  %v60_v6 = vld [vmem:[%s3234_s4 + $0x128] sm:$0xff] }
 0x79c   :  { %v3106_v9 = vadd.f32 %v1525_v37, %v1520_v8  ;;  %1530 = vadd.xlane.f32.xlu0 %v3101_v7  ;;  %v1535_v12 = vmul.f32 %v3101_v7, %v3101_v7  ;;  %v65_v37 = vld [vmem:[%s3234_s4 + $0x150] sm:$0xff]  ;;  %v59_v8 = vld [vmem:[%s3234_s4 + $0x120] sm:$0xff] }
 0x79d   :  { %2210 = vmatprep.subr.mxu0 %v65_v37 }
 0x79e   :  { %1528 = vadd.xlane.f32.xlu1 %v3106_v9  ;;  %v1534_v11 = vmul.f32 %v3106_v9, %v3106_v9  ;;  %2211 = vmatpush3.msra.mxu0 %v65_v37 }
 0x79f   :  { %2212 = vmatprep.subr.mxu0 %v64_v44 }
 0x7a0   :  { %1536 = vadd.xlane.f32.xlu0 %v1534_v11  ;;  %2213 = vmatpush3.msra.mxu0 %v64_v44  ;;  %v58_v11 = vld [vmem:[%s3234_s4 + $0x118] sm:$0xff] }
 0x7a1   :  { %2214 = vmatprep.subr.mxu0 %v63_v63 }
 0x7a2   :  { %2215 = vmatpush3.msra.mxu0 %v63_v63 }
 0x7a3   :  { %2216 = vmatprep.subr.mxu0 %v62_v2 }
 0x7a4   :  { %1538 = vadd.xlane.f32.xlu0 %v1535_v12  ;;  %2217 = vmatpush3.msra.mxu0 %v62_v2  ;;  %v57_v12 = vld [vmem:[%s3234_s4 + $0x110] sm:$0xff]  ;;  %s2312_s4 = smov [#allocation2]  }
 0x7a5   :  { %2218 = vmatprep.subr.mxu0 %v61_v4  ;;  %s1789_s13 = sshll.u32 %s2312_s4, 4  ;;  %s1790_s13 = int_to_ptr.vmem [resolvable:$true] %s1789_s13 }
 0x7a6   :  { %2219 = vmatpush3.msra.mxu0 %v61_v4  ;;  %s2286_s14 = scalar_lea.vmem %s1790_s13, 256  ;;  %p2291_p1 = scmp.lt.s32.totalorder %s1790_s13, %s1790_s13 }
 0x7a7   :  { %2220 = vmatprep.subr.mxu0 %v60_v6  ;;  %p2287_p0 = scmp.ne.s32.totalorder %s1790_s13, %s2286_s14  ;;  %p2292_p2 = scmp.lt.s32.totalorder %s2286_s14, %s2286_s14 }
 0x7a8   :  { %2221 = vmatpush3.msra.mxu0 %v60_v6 }
 0x7a9   :  { %2222 = vmatprep.subr.mxu0 %v59_v8  ;;  %p2293_p3 = por %p2292_p2, %p2291_p1 }
 0x7aa   :  { %2223 = vmatpush3.msra.mxu0 %v59_v8 }
 0x7ab   :  { %2224 = vmatprep.subr.mxu0 %v58_v11  ;;  %p2294_p4 = pnand %p2293_p3, %p2287_p0 }
 0x7ac   :  { %2225 = vmatpush3.msra.mxu0 %v58_v11 }
 0x7ad   :  { %2226 = vmatprep.subr.mxu0 %v57_v12 }
 0x7ae   :  { %2227 = vmatpush3.msra.mxu0 %v57_v12 }
 0x7af   :  { %2228 = vmatprep.subr.mxu0 %v56_v13 }
 0x7b0   :  { %2229 = vmatpush3.msra.mxu0 %v56_v13 }
 0x7b1   :  { %2230 = vmatprep.subr.mxu0 %v55_v14 }
 0x7b2   :  { %2231 = vmatpush3.msra.mxu0 %v55_v14 }
 0x825   :  { %v1531_v3 = vpop.xlane.xlu0 %1530 }
 0x826   :  { %v1533_v31 = vmul.f32 0.03125, %v1531_v3 }
 0x827   :  { %v1529_v27 = vpop.xlane.xlu1 %1528 }
 0x828   :  { %v1532_v28 = vmul.f32 0.03125, %v1529_v27  ;;  %v1543_v35 = vmul.f32 %v1533_v31, %v1533_v31  ;;  %v1549_v51 = vsub.f32 %v3101_v7, %v1533_v31  ;;  %v1663_v27 = vsub.s32 5, %v2512_v10 }
 0x829   :  { %v1537_v29 = vpop.xlane.xlu0 %1536 }
 0x82a   :  { %v1542_v32 = vmul.f32 %v1532_v28, %v1532_v28  ;;  %v1540_v33 = vmul.f32 0.03125, %v1537_v29  ;;  %v1548_v45 = vsub.f32 %v3106_v9, %v1532_v28  ;;  %v1664_v28 = vrot.slane %v3095_v62, %v1663_v27 }
 0x82c   :  { %v1544_v34 = vsub.f32 %v1540_v33, %v1542_v32 }
 0x82d   :  { %v1539_v5 = vpop.xlane.xlu0 %1538 }
 0x82e   :  { %v1546_v36 = vmax.f32 %v1544_v34, 0.0  ;;  %v1541_v50 = vmul.f32 0.03125, %v1539_v5 }
 0x830   :  { %v1550_v38 = vadd.f32 1e-05, %v1546_v36  ;;  %v1545_v39 = vsub.f32 %v1541_v50, %v1543_v35 }
 0x832   :  { %2267 = vrsqrt.f32 %v1550_v38  ;;  %v1547_v40 = vmax.f32 %v1545_v39, 0.0 }
 0x834   :  { %v1551_v41 = vadd.f32 1e-05, %v1547_v40 }
 0x836   :  { %2269 = vrsqrt.f32 %v1551_v41 }
 0x83f   :  { %v2268_v47 = vpop.eup %2267 }
 0x840   :  { %v1554_v48 = vmul.f32 %v2268_v47, %v1548_v45 }
 0x842   :  { %v1560_v52 = vmul.f32 %v1559_v46, %v1554_v48 }
 0x843   :  { %v2270_v53 = vpop.eup %2269 }
 0x844   :  { %v1566_v54 = vadd.f32 %v1565_v49, %v1560_v52  ;;  %v1555_v55 = vmul.f32 %v2270_v53, %v1549_v51  ;;  %v1772_v53 = vsub.s32 6, %v2512_v10 }
 0x846   :  { %2197 = vmatprep.mubr.f32.mxu1 %v1566_v54  ;;  %v1561_v56 = vmul.f32 %v1559_v46, %v1555_v55  ;;  %v1778_v54 = vsub.s32 7, %v2512_v10 }
 0x848   :  { %v1567_v30 = vadd.f32 %v1565_v49, %v1561_v56  ;;  %v1773_v56 = vrot.slane %v3095_v62, %v1772_v53  ;;  %v1779_v59 = vrot.slane %v3095_v62, %v1778_v54 }
 0x84a   :  { %2198 = vmatmul.mubr.f32.vlgmr.msra.gmra.mxu1 %v1567_v30 }
 0x90a   :  { %v2199_v16 = vpop.f32.mrf.mxu1 }
 0x90b   :  { %v1644_v17 = vadd.f32 %v2199_v16, %v1812_v15 }
 0x90c   :  { %v1638_v18 = vpop.f32.mrf.mxu1 }
 0x90d   :  { %v1814_v19 = vmul.f32 -1.442695, %v1644_v17  ;;  %v1639_v20 = vadd.f32 %v1812_v15, %v1638_v18 }
 0x90f   :  { %2271 = vpow2.f32 %v1814_v19  ;;  %v1813_v21 = vmul.f32 -1.442695, %v1639_v20 }
 0x911   :  { %2273 = vpow2.f32 %v1813_v21 }
 0x91c   :  { %v2272_v22 = vpop.eup %2271 }
 0x91d   :  { %v1654_v23 = vadd.f32 1.0, %v2272_v22 }
 0x91e   :  { %v2274_v24 = vpop.eup %2273 }
 0x91f   :  { %v1653_v25 = vadd.f32 1.0, %v2274_v24  ;;  %2275 = vrcp.f32 %v1654_v23 }
 0x921   :  { %2277 = vrcp.f32 %v1653_v25 }
 0x92c   :  { %v2276_v26 = vpop.eup %2275 }
 0x92d   :  { %v1660_v3 = vmul.f32 %v2276_v26, %v1644_v17 }
 0x92e   :  { %v2278_v1 = vpop.eup %2277 }
 0x92f   :  { %v1659_v0 = vmul.f32 %v2278_v1, %v1639_v20 }
 0x931   :  { %2232 = vmatprep.mubr.f32.mxu0 %v1659_v0 }
 0x932   :  { %2233 = vmatmul.mubr.f32.vlgmr.msra.gmra.mxu0 %v1660_v3 }
 0x9f2   :  { %v2234_v29 = vpop.f32.mrf.mxu0 }
 0x9f3   :  { %v1737_v31 = vadd.f32 %v2234_v29, %v1664_v28 }
 0x9f4   :  { %v1731_v32 = vpop.f32.mrf.mxu0 }
 0x9f5   :  { %v1741_v33 = vadd.f32 %v1737_v31, %v3101_v7  ;;  %v1732_v34 = vadd.f32 %v1731_v32, %v1664_v28 }
 0x9f7   :  { %v1740_v5 = vadd.f32 %v1732_v34, %v3106_v9  ;;  %1744 = vadd.xlane.f32.xlu0 %v1741_v33  ;;  %v1749_v35 = vmul.f32 %v1741_v33, %v1741_v33 }
 0x9f9   :  { %1742 = vadd.xlane.f32.xlu1 %v1740_v5  ;;  %v1748_v36 = vmul.f32 %v1740_v5, %v1740_v5 }
 0x9fb   :  { %1752 = vadd.xlane.f32.xlu0 %v1749_v35 }
 0x9fd   :  { %1750 = vadd.xlane.f32.xlu1 %v1748_v36 }
 0xa80   :  { %v1745_v50 = vpop.xlane.xlu0 %1744 }
 0xa81   :  { %v1747_v38 = vmul.f32 0.03125, %v1745_v50 }
 0xa82   :  { %v1743_v39 = vpop.xlane.xlu1 %1742 }
 0xa83   :  { %v1746_v40 = vmul.f32 0.03125, %v1743_v39  ;;  %v1757_v42 = vmul.f32 %v1747_v38, %v1747_v38  ;;  %v1763_v55 = vsub.f32 %v1741_v33, %v1747_v38 }
 0xa84   :  { %v1753_v41 = vpop.xlane.xlu0 %1752 }
 0xa85   :  { %v1755_v43 = vmul.f32 0.03125, %v1753_v41  ;;  %v1756_v46 = vmul.f32 %v1746_v40, %v1746_v40  ;;  %v1762_v57 = vsub.f32 %v1740_v5, %v1746_v40 }
 0xa86   :  { %v1751_v45 = vpop.xlane.xlu1 %1750 }
 0xa87   :  { %v1759_v47 = vsub.f32 %v1755_v43, %v1757_v42  ;;  %v1754_v7 = vmul.f32 0.03125, %v1751_v45 }
 0xa89   :  { %v1761_v48 = vmax.f32 %v1759_v47, 0.0  ;;  %v1758_v49 = vsub.f32 %v1754_v7, %v1756_v46 }
 0xa8b   :  { %v1765_v9 = vadd.f32 1e-05, %v1761_v48  ;;  %v1760_v51 = vmax.f32 %v1758_v49, 0.0 }
 0xa8d   :  { %2279 = vrsqrt.f32 %v1765_v9  ;;  %v1764_v52 = vadd.f32 1e-05, %v1760_v51 }
 0xa8f   :  { %2281 = vrsqrt.f32 %v1764_v52 }
 0xa9a   :  { %v2280_v30 = vpop.eup %2279 }
 0xa9b   :  { %v1769_v58 = vmul.f32 %v2280_v30, %v1763_v55 }
 0xa9c   :  { %v2282_v60 = vpop.eup %2281 }
 0xa9d   :  { %v1768_v61 = vmul.f32 %v2282_v60, %v1762_v57  ;;  %v1775_v37 = vmul.f32 %v1773_v56, %v1769_v58 }
 0xa9f   :  { %v1774_v44 = vmul.f32 %v1773_v56, %v1768_v61  ;;  %v1781_v63 = vadd.f32 %v1779_v59, %v1775_v37 }
 0xaa1   :  { %v1780_v2 = vadd.f32 %v1779_v59, %v1774_v44  ;;  %1783 = vst [vmem:[#allocation2 + $0x8] sm:$0xff] %v1781_v63 }
 0xaa3   :  { %1782 = vst [vmem:[#allocation2] sm:$0xff] %v1780_v2 }
 0xaa4   :  { %2297 = shalt.err (!%p2294_p4)
}
 0xaa5   :  { %s2313_s15 = smov 128   ;;  %s2314_s16 = smov 8  }
 0xaa6   :  { %1795 = dma.vmem_to_hbm [thread:$0]  %s1790_s13, 256, %s3235_s5, [#allocation3], %s2313_s15, %s2313_s15, %s2314_s16  }
 0xaa7   :  { %2306 = dma.done.wait [#allocation3], 256  }
 0xaa8   :  { %2307 = vsyncadd [#allocation3], 4294967040 }
 0xaa9   :  { %1799 = vsyncpa [#allocation3], 1 }

</bundles_post_ra>
